<compile_context>
chip_gen: v7x
topology: tpu7x:2x2x1
jax: 0.10.0
libtpu: 0.0.40
codegen_flags: <defaults>
</compile_context>

<pallas_src>
import jax
import jax.numpy as jnp
from jax import lax
from jax.experimental import pallas as pl
from jax.experimental.pallas import tpu as pltpu

# ---- model hyper-parameters (small, consistent with the module) -------------
D_MODEL = 32
NHEADS = 4
DIM_FFC = 64
EPS = 1e-5            # nn.LayerNorm default eps
TGT_LEN = 8           # target sequence length  (x / query_pos)
MEM_LEN = 16          # memory sequence length  (memory / pos)
BATCH = 2
# activation = "relu", normalize_before = False, dropout -> identity (eval)

# ---- packed parameter layout -------------------------------------------------
# w_wide : (2D, 2D)  rows 0:D   -> [Wq_self^T | Wk_self^T]  (D, 2D)  fused q/k proj
#                    rows D:2D  -> W1^T                      (D, F)
# w_d    : (8D, D)   rows 0:D   -> Wv_self^T
#                    rows D:2D  -> Wo_self^T
#                    rows 2D:3D -> Wq_cross^T
#                    rows 3D:4D -> Wk_cross^T
#                    rows 4D:5D -> Wv_cross^T
#                    rows 5D:6D -> Wo_cross^T
#                    rows 6D:8D -> W2^T                      (F, D)
# vecs   : (18, 2D)  one vector per row (lanes 0:D unless noted)
R_BQ_S, R_BK_S, R_BV_S, R_BO_S = 0, 1, 2, 3
R_BQ_C, R_BK_C, R_BV_C, R_BO_C = 4, 5, 6, 7
R_B2, R_LN1_G, R_LN1_B, R_LN2_G, R_LN2_B = 8, 9, 10, 11, 12
R_B1 = 13            # linear1 bias, full 2*D lanes
R_MASK0 = 14         # rows 14..17: per-head column masks (1.0 on that head's lanes)
N_VEC_ROWS = R_MASK0 + NHEADS


def _layernorm(x, gamma, beta):
    mu = jnp.mean(x, axis=-1, keepdims=True)
    var = jnp.mean((x - mu) ** 2, axis=-1, keepdims=True)
    return (x - mu) * lax.rsqrt(var + EPS) * gamma + beta


def decoder_layer_kernel(x_ref, qpos_ref, mem_ref, mpos_ref,
                         w_d_ref, w_wide_ref, vecs_ref, o_ref):
    D, H, F = D_MODEL, NHEADS, DIM_FFC
    hd = D // H
    scale = 1.0 / (hd ** 0.5)

    x = x_ref[0].astype(jnp.float32)        # (T, D)
    qpos = qpos_ref[0].astype(jnp.float32)  # (T, D)
    mem = mem_ref[0].astype(jnp.float32)    # (M, D)
    mpos = mpos_ref[0].astype(jnp.float32)  # (M, D)

    def vec(r, n=D):
        # One packed vector; static slice of the vecs slab (free at runtime).
        return vecs_ref[r:r + 1, 0:n]       # (1, n)

    def mha(q, k, v, w_o, b_o):
        """Multi-head attention with heads batched along the row (sublane) axis.

        q: (Tq, D) already biased & scaled; k, v: (Tk, D) already biased.
        Row-block h holds q masked to head h's columns, so a single
        (H*Tq, D) x (Tk, D)^T matmul yields all per-head score matrices, one
        softmax covers all heads, and a single PV matmul produces all outputs.
        """
        Tq = q.shape[0]
        q_stack = jnp.concatenate(
            [q * vec(R_MASK0 + h) for h in range(H)], axis=0)         # (H*Tq, D)
        s = lax.dot_general(q_stack, k, (((1,), (1,)), ((), ())),
                            preferred_element_type=jnp.float32)       # (H*Tq, Tk)
        s = s - jnp.max(s, axis=-1, keepdims=True)
        p = jnp.exp(s)
        p = p * pl.reciprocal(jnp.sum(p, axis=-1, keepdims=True), approx=False)
        o_stack = jnp.dot(p, v, preferred_element_type=jnp.float32)   # (H*Tq, D)
        # Head h's valid output lives in rows [h*Tq, (h+1)*Tq) and head-h columns;
        # mask-and-add reassembles the usual (Tq, D) concat-of-heads layout.
        o = o_stack[0:Tq, :] * vec(R_MASK0)
        for h in range(1, H):
            o = o + o_stack[h * Tq:(h + 1) * Tq, :] * vec(R_MASK0 + h)
        return jnp.dot(o, w_o, preferred_element_type=jnp.float32) + b_o

    # --- self attention: q = k = x + query_pos, value = x ---------------------
    qk_in = x + qpos
    qk = jnp.dot(qk_in, w_wide_ref[0:D, :],
                 preferred_element_type=jnp.float32)                  # (T, 2D)
    q_s = (qk[:, 0:D] + vec(R_BQ_S)) * scale
    k_s = qk[:, D:2 * D] + vec(R_BK_S)
    v_s = jnp.dot(x, w_d_ref[0:D, :],
                  preferred_element_type=jnp.float32) + vec(R_BV_S)
    sa = mha(q_s, k_s, v_s, w_d_ref[D:2 * D, :], vec(R_BO_S))

    x = _layernorm(x + sa, vec(R_LN1_G), vec(R_LN1_B))                # norm1

    # --- cross attention: q = x + query_pos, k = memory + pos, v = memory -----
    q_c = (jnp.dot(x + qpos, w_d_ref[2 * D:3 * D, :],
                   preferred_element_type=jnp.float32) + vec(R_BQ_C)) * scale
    k_c = jnp.dot(mem + mpos, w_d_ref[3 * D:4 * D, :],
                  preferred_element_type=jnp.float32) + vec(R_BK_C)
    v_c = jnp.dot(mem, w_d_ref[4 * D:5 * D, :],
                  preferred_element_type=jnp.float32) + vec(R_BV_C)
    ca = mha(q_c, k_c, v_c, w_d_ref[5 * D:6 * D, :], vec(R_BO_C))

    x = _layernorm(x + ca, vec(R_LN2_G), vec(R_LN2_B))                # norm2

    # --- feed forward: linear1 -> relu -> linear2 ------------------------------
    ffn = jnp.dot(x, w_wide_ref[D:2 * D, :],
                  preferred_element_type=jnp.float32) + vec(R_B1, F)
    ffn = jnp.maximum(ffn, 0.0)
    y = jnp.dot(ffn, w_d_ref[6 * D:8 * D, :],
                preferred_element_type=jnp.float32) + vec(R_B2)

    # forward_post applies norm2 AGAIN here (the module never uses norm3).
    x = _layernorm(x + y, vec(R_LN2_G), vec(R_LN2_B))

    o_ref[0] = x.astype(o_ref.dtype)


def make_params(key):
    """PyTorch-layout parameters of TransformerDecoderLayer (eval mode)."""
    D, F = D_MODEL, DIM_FFC
    ks = jax.random.split(key, 16)

    def rn(k, shape):
        return jax.random.normal(k, shape, jnp.float32) * 0.05

    return {
        # self-attention (nn.MultiheadAttention packed in_proj layout)
        "self_in_w": rn(ks[0], (3 * D, D)), "self_in_b": rn(ks[1], (3 * D,)),
        "self_out_w": rn(ks[2], (D, D)),    "self_out_b": rn(ks[3], (D,)),
        # cross-attention
        "cross_in_w": rn(ks[4], (3 * D, D)), "cross_in_b": rn(ks[5], (3 * D,)),
        "cross_out_w": rn(ks[6], (D, D)),    "cross_out_b": rn(ks[7], (D,)),
        # FFN
        "l1_w": rn(ks[8], (F, D)),  "l1_b": rn(ks[9], (F,)),
        "l2_w": rn(ks[10], (D, F)), "l2_b": rn(ks[11], (D,)),
        # LayerNorms (norm3 exists in the module but forward_post never uses it)
        "ln1_g": 1.0 + rn(ks[12], (D,)), "ln1_b": rn(ks[13], (D,)),
        "ln2_g": 1.0 + rn(ks[14], (D,)), "ln2_b": rn(ks[15], (D,)),
    }


def pack_params(p):
    """One-time repack (outside the jitted hot path): pre-transpose all weights
    and consolidate the small vectors + head masks into three packed slabs."""
    D, F, H = D_MODEL, DIM_FFC, NHEADS
    hd = D // H
    assert F <= 2 * D, "vecs slab width assumes dim_ffc <= 2*d_model"

    w_wide = jnp.concatenate([
        p["self_in_w"][0:2 * D].T,        # (D, 2D) fused q/k projection (self)
        p["l1_w"].T,                      # (D, F)
    ], axis=0).astype(jnp.float32)        # (2D, 2D)

    w_d = jnp.concatenate([
        p["self_in_w"][2 * D:3 * D].T,    # Wv self
        p["self_out_w"].T,                # Wo self
        p["cross_in_w"][0:D].T,           # Wq cross
        p["cross_in_w"][D:2 * D].T,       # Wk cross
        p["cross_in_w"][2 * D:3 * D].T,   # Wv cross
        p["cross_out_w"].T,               # Wo cross
        p["l2_w"].T,                      # (F, D)
    ], axis=0).astype(jnp.float32)        # (8D, D)

    def row(v):
        v = jnp.asarray(v, jnp.float32)
        return jnp.pad(v, (0, 2 * D - v.shape[0]))[None, :]

    head_mask = (jnp.arange(D)[None, :] // hd ==
                 jnp.arange(H)[:, None]).astype(jnp.float32)          # (H, D)
    head_mask = jnp.pad(head_mask, ((0, 0), (0, 2 * D - D)))          # (H, 2D)

    vecs = jnp.concatenate([
        row(p["self_in_b"][0:D]), row(p["self_in_b"][D:2 * D]),
        row(p["self_in_b"][2 * D:3 * D]), row(p["self_out_b"]),
        row(p["cross_in_b"][0:D]), row(p["cross_in_b"][D:2 * D]),
        row(p["cross_in_b"][2 * D:3 * D]), row(p["cross_out_b"]),
        row(p["l2_b"]),
        row(p["ln1_g"]), row(p["ln1_b"]), row(p["ln2_g"]), row(p["ln2_b"]),
        row(p["l1_b"]),
        head_mask,
    ], axis=0)                                                        # (18, 2D)
    assert vecs.shape[0] == N_VEC_ROWS

    return {"w_d": w_d, "w_wide": w_wide, "vecs": vecs}


@jax.jit
def transformer_decoder_layer(x, memory, pos, query_pos, packed):
    """forward_post of TransformerDecoderLayer (eval mode).

    Batch-first layout: x, query_pos are (B, T, D); memory, pos are (B, M, D).
    This is the same math as PyTorch's seq-first (L, B, D) layout but avoids any
    activation transposes around the kernel (per performance review).
    """
    B, T, D = x.shape
    M = memory.shape[1]
    w_d, w_wide, vecs = packed["w_d"], packed["w_wide"], packed["vecs"]

    def whole(a):
        return pl.BlockSpec(a.shape, lambda b: (0,) * a.ndim)

    grid_spec = pltpu.PrefetchScalarGridSpec(
        num_scalar_prefetch=0,
        grid=(B,),
        in_specs=[
            pl.BlockSpec((1, T, D), lambda b: (b, 0, 0)),   # x
            pl.BlockSpec((1, T, D), lambda b: (b, 0, 0)),   # query_pos
            pl.BlockSpec((1, M, D), lambda b: (b, 0, 0)),   # memory
            pl.BlockSpec((1, M, D), lambda b: (b, 0, 0)),   # pos
            whole(w_d), whole(w_wide), whole(vecs),
        ],
        out_specs=pl.BlockSpec((1, T, D), lambda b: (b, 0, 0)),
    )

    return pl.pallas_call(
        decoder_layer_kernel,
        out_shape=jax.ShapeDtypeStruct((B, T, D), x.dtype),
        grid_spec=grid_spec,
        compiler_params=pltpu.CompilerParams(
            dimension_semantics=("parallel",)),   # 2 batch elems -> 2 TCs on v7x
    )(x, query_pos, memory, pos, w_d, w_wide, vecs)


# --------------------------- pure-JAX reference -------------------------------
def reference_forward_post(x, memory, pos, query_pos, p):
    D, H = D_MODEL, NHEADS
    hd = D // H

    def mha(q_in, k_in, v_in, w_in, b_in, w_out, b_out):
        q = q_in @ w_in[0:D].T + b_in[0:D]
        k = k_in @ w_in[D:2 * D].T + b_in[D:2 * D]
        v = v_in @ w_in[2 * D:].T + b_in[2 * D:]
        Tq, Tk = q.shape[0], k.shape[0]
        qh = q.reshape(Tq, H, hd).transpose(1, 0, 2) / (hd ** 0.5)
        kh = k.reshape(Tk, H, hd).transpose(1, 0, 2)
        vh = v.reshape(Tk, H, hd).transpose(1, 0, 2)
        a = jax.nn.softmax(jnp.einsum("hqd,hkd->hqk", qh, kh), axis=-1)
        o = jnp.einsum("hqk,hkd->hqd", a, vh).transpose(1, 0, 2).reshape(Tq, D)
        return o @ w_out.T + b_out

    def one(xb, memb, posb, qposb):
        sa = mha(xb + qposb, xb + qposb, xb,
                 p["self_in_w"], p["self_in_b"], p["self_out_w"], p["self_out_b"])
        x1 = _layernorm(xb + sa, p["ln1_g"], p["ln1_b"])
        ca = mha(x1 + qposb, memb + posb, memb,
                 p["cross_in_w"], p["cross_in_b"], p["cross_out_w"], p["cross_out_b"])
        x2 = _layernorm(x1 + ca, p["ln2_g"], p["ln2_b"])
        f = jax.nn.relu(x2 @ p["l1_w"].T + p["l1_b"])
        y = f @ p["l2_w"].T + p["l2_b"]
        return _layernorm(x2 + y, p["ln2_g"], p["ln2_b"])   # forward_post reuses norm2

    return jax.vmap(one)(x, memory, pos, query_pos)


if __name__ == "__main__":
    key = jax.random.PRNGKey(0)
    kx, km, kp, kq, kw = jax.random.split(key, 5)
    x = jax.random.normal(kx, (BATCH, TGT_LEN, D_MODEL), jnp.float32)
    memory = jax.random.normal(km, (BATCH, MEM_LEN, D_MODEL), jnp.float32)
    pos = jax.random.normal(kp, (BATCH, MEM_LEN, D_MODEL), jnp.float32)
    query_pos = jax.random.normal(kq, (BATCH, TGT_LEN, D_MODEL), jnp.float32)

    params = make_params(kw)
    packed = pack_params(params)        # one-time weight repack, outside hot path

    out = transformer_decoder_layer(x, memory, pos, query_pos, packed)
    out = jax.block_until_ready(out)

    ref = reference_forward_post(x, memory, pos, query_pos, params)
    assert out.shape == (BATCH, TGT_LEN, D_MODEL)
    assert jnp.allclose(out, ref, atol=2e-4, rtol=2e-4), \
        "mismatch vs pure-JAX reference"
    print("KERNEL_OK")
</pallas_src>

<mosaic_0001>
module attributes {stable_mosaic.version = 11 : i64} {
  func.func @decoder_layer_kernel(%arg0: i32, %arg1: memref<1x8x32xf32, #tpu.memory_space<vmem>>, %arg2: memref<1x8x32xf32, #tpu.memory_space<vmem>>, %arg3: memref<1x16x32xf32, #tpu.memory_space<vmem>>, %arg4: memref<1x16x32xf32, #tpu.memory_space<vmem>>, %arg5: memref<256x32xf32, #tpu.memory_space<vmem>>, %arg6: memref<64x64xf32, #tpu.memory_space<vmem>>, %arg7: memref<18x64xf32, #tpu.memory_space<vmem>>, %arg8: memref<1x8x32xf32, #tpu.memory_space<vmem>>) attributes {dimension_semantics = [#tpu.dimension_semantics<parallel>], iteration_bounds = array<i64: 2>, scalar_prefetch = 0 : i64, scratch_operands = 0 : i64, tpu.core_type = #tpu.core_type<tc>, window_params = [{transform_indices = @transform_0, window_bounds = array<i64: 1, 8, 32>}, {transform_indices = @transform_1, window_bounds = array<i64: 1, 8, 32>}, {transform_indices = @transform_2, window_bounds = array<i64: 1, 16, 32>}, {transform_indices = @transform_3, window_bounds = array<i64: 1, 16, 32>}, {pipeline_mode = #tpu.pipeline_mode<synchronous>, transform_indices = @transform_4, window_bounds = array<i64: 256, 32>}, {pipeline_mode = #tpu.pipeline_mode<synchronous>, transform_indices = @transform_5, window_bounds = array<i64: 64, 64>}, {pipeline_mode = #tpu.pipeline_mode<synchronous>, transform_indices = @transform_6, window_bounds = array<i64: 18, 64>}, {transform_indices = @transform_7, window_bounds = array<i64: 1, 8, 32>}]} {
    %c0 = arith.constant 0 : index
    %c0_0 = arith.constant 0 : index
    %c0_1 = arith.constant 0 : index
    %0 = vector.load %arg1[%c0, %c0_0, %c0_1] : memref<1x8x32xf32, #tpu.memory_space<vmem>>, vector<1x8x32xf32>
    %1 = vector.shape_cast %0 : vector<1x8x32xf32> to vector<8x32xf32>
    %c0_2 = arith.constant 0 : index
    %c0_3 = arith.constant 0 : index
    %c0_4 = arith.constant 0 : index
    %2 = vector.load %arg2[%c0_2, %c0_3, %c0_4] : memref<1x8x32xf32, #tpu.memory_space<vmem>>, vector<1x8x32xf32>
    %3 = vector.shape_cast %2 : vector<1x8x32xf32> to vector<8x32xf32>
    %c0_5 = arith.constant 0 : index
    %c0_6 = arith.constant 0 : index
    %c0_7 = arith.constant 0 : index
    %4 = vector.load %arg3[%c0_5, %c0_6, %c0_7] : memref<1x16x32xf32, #tpu.memory_space<vmem>>, vector<1x16x32xf32>
    %5 = vector.shape_cast %4 : vector<1x16x32xf32> to vector<16x32xf32>
    %c0_8 = arith.constant 0 : index
    %c0_9 = arith.constant 0 : index
    %c0_10 = arith.constant 0 : index
    %6 = vector.load %arg4[%c0_8, %c0_9, %c0_10] : memref<1x16x32xf32, #tpu.memory_space<vmem>>, vector<1x16x32xf32>
    %7 = vector.shape_cast %6 : vector<1x16x32xf32> to vector<16x32xf32>
    %8 = arith.addf %1, %3 : vector<8x32xf32>
    %c0_11 = arith.constant 0 : index
    %c0_12 = arith.constant 0 : index
    %9 = vector.load %arg6[%c0_11, %c0_12] : memref<64x64xf32, #tpu.memory_space<vmem>>, vector<32x64xf32>
    %cst = arith.constant dense<0.000000e+00> : vector<8x64xf32>
    %10 = tpu.matmul %8, %9, %cst {dimension_numbers = #tpu.dot_dimension_numbers<[1], [0], [0], [1], [0, 0, 1, 1], [], []>} : vector<8x32xf32>, vector<32x64xf32>, vector<8x64xf32> -> vector<8x64xf32>
    %11 = vector.extract_strided_slice %10 {offsets = [0, 0], sizes = [8, 32], strides = [1, 1]} : vector<8x64xf32> to vector<8x32xf32>
    %c0_13 = arith.constant 0 : index
    %c0_14 = arith.constant 0 : index
    %12 = vector.load %arg7[%c0_13, %c0_14] : memref<18x64xf32, #tpu.memory_space<vmem>>, vector<1x32xf32>
    %13 = vector.broadcast %12 : vector<1x32xf32> to vector<8x32xf32>
    %14 = arith.addf %11, %13 : vector<8x32xf32>
    %cst_15 = arith.constant 0.353553385 : f32
    %15 = vector.broadcast %cst_15 : f32 to vector<8x32xf32>
    %16 = arith.mulf %14, %15 : vector<8x32xf32>
    %17 = vector.extract_strided_slice %10 {offsets = [0, 32], sizes = [8, 32], strides = [1, 1]} : vector<8x64xf32> to vector<8x32xf32>
    %c1 = arith.constant 1 : index
    %c0_16 = arith.constant 0 : index
    %18 = vector.load %arg7[%c1, %c0_16] : memref<18x64xf32, #tpu.memory_space<vmem>>, vector<1x32xf32>
    %19 = vector.broadcast %18 : vector<1x32xf32> to vector<8x32xf32>
    %20 = arith.addf %17, %19 : vector<8x32xf32>
    %c0_17 = arith.constant 0 : index
    %c0_18 = arith.constant 0 : index
    %21 = vector.load %arg5[%c0_17, %c0_18] : memref<256x32xf32, #tpu.memory_space<vmem>>, vector<32x32xf32>
    %cst_19 = arith.constant dense<0.000000e+00> : vector<8x32xf32>
    %22 = tpu.matmul %1, %21, %cst_19 {dimension_numbers = #tpu.dot_dimension_numbers<[1], [0], [0], [1], [0, 0, 1, 1], [], []>} : vector<8x32xf32>, vector<32x32xf32>, vector<8x32xf32> -> vector<8x32xf32>
    %c2 = arith.constant 2 : index
    %c0_20 = arith.constant 0 : index
    %23 = vector.load %arg7[%c2, %c0_20] : memref<18x64xf32, #tpu.memory_space<vmem>>, vector<1x32xf32>
    %24 = vector.broadcast %23 : vector<1x32xf32> to vector<8x32xf32>
    %25 = arith.addf %22, %24 : vector<8x32xf32>
    %c32 = arith.constant 32 : index
    %c0_21 = arith.constant 0 : index
    %26 = vector.load %arg5[%c32, %c0_21] : memref<256x32xf32, #tpu.memory_space<vmem>>, vector<32x32xf32>
    %c3 = arith.constant 3 : index
    %c0_22 = arith.constant 0 : index
    %27 = vector.load %arg7[%c3, %c0_22] : memref<18x64xf32, #tpu.memory_space<vmem>>, vector<1x32xf32>
    %c14 = arith.constant 14 : index
    %c0_23 = arith.constant 0 : index
    %28 = vector.load %arg7[%c14, %c0_23] : memref<18x64xf32, #tpu.memory_space<vmem>>, vector<1x32xf32>
    %29 = vector.broadcast %28 : vector<1x32xf32> to vector<8x32xf32>
    %30 = arith.mulf %16, %29 : vector<8x32xf32>
    %c15 = arith.constant 15 : index
    %c0_24 = arith.constant 0 : index
    %31 = vector.load %arg7[%c15, %c0_24] : memref<18x64xf32, #tpu.memory_space<vmem>>, vector<1x32xf32>
    %32 = vector.broadcast %31 : vector<1x32xf32> to vector<8x32xf32>
    %33 = arith.mulf %16, %32 : vector<8x32xf32>
    %c16 = arith.constant 16 : index
    %c0_25 = arith.constant 0 : index
    %34 = vector.load %arg7[%c16, %c0_25] : memref<18x64xf32, #tpu.memory_space<vmem>>, vector<1x32xf32>
    %35 = vector.broadcast %34 : vector<1x32xf32> to vector<8x32xf32>
    %36 = arith.mulf %16, %35 : vector<8x32xf32>
    %c17 = arith.constant 17 : index
    %c0_26 = arith.constant 0 : index
    %37 = vector.load %arg7[%c17, %c0_26] : memref<18x64xf32, #tpu.memory_space<vmem>>, vector<1x32xf32>
    %38 = vector.broadcast %37 : vector<1x32xf32> to vector<8x32xf32>
    %39 = arith.mulf %16, %38 : vector<8x32xf32>
    %40 = tpu.concatenate %30, %33, %36, %39 in 0 : vector<8x32xf32>, vector<8x32xf32>, vector<8x32xf32>, vector<8x32xf32> -> vector<32x32xf32>
    %cst_27 = arith.constant dense<0.000000e+00> : vector<32x8xf32>
    %41 = tpu.matmul %40, %20, %cst_27 {dimension_numbers = #tpu.dot_dimension_numbers<[1], [1], [0], [0], [0, 0, 1, 0], [], []>} : vector<32x32xf32>, vector<8x32xf32>, vector<32x8xf32> -> vector<32x8xf32>
    %cst_28 = arith.constant dense<0xFF800000> : vector<32xf32>
    %42 = vector.multi_reduction <maximumf>, %41, %cst_28 [1] : vector<32x8xf32> to vector<32xf32>
    %43 = vector.shape_cast %42 : vector<32xf32> to vector<32x1xf32>
    %44 = vector.broadcast %43 : vector<32x1xf32> to vector<32x8xf32>
    %45 = arith.subf %41, %44 : vector<32x8xf32>
    %46 = math.exp %45 : vector<32x8xf32>
    %cst_29 = arith.constant dense<0.000000e+00> : vector<32xf32>
    %47 = vector.multi_reduction <add>, %46, %cst_29 [1] : vector<32x8xf32> to vector<32xf32>
    %48 = vector.shape_cast %47 : vector<32xf32> to vector<32x1xf32>
    %49 = tpu.reciprocal %48 : vector<32x1xf32> -> vector<32x1xf32>
    %50 = vector.broadcast %49 : vector<32x1xf32> to vector<32x8xf32>
    %51 = arith.mulf %46, %50 : vector<32x8xf32>
    %cst_30 = arith.constant dense<0.000000e+00> : vector<32x32xf32>
    %52 = tpu.matmul %51, %25, %cst_30 {dimension_numbers = #tpu.dot_dimension_numbers<[1], [0], [0], [1], [0, 0, 1, 1], [], []>} : vector<32x8xf32>, vector<8x32xf32>, vector<32x32xf32> -> vector<32x32xf32>
    %53 = vector.extract_strided_slice %52 {offsets = [0, 0], sizes = [8, 32], strides = [1, 1]} : vector<32x32xf32> to vector<8x32xf32>
    %c14_31 = arith.constant 14 : index
    %c0_32 = arith.constant 0 : index
    %54 = vector.load %arg7[%c14_31, %c0_32] : memref<18x64xf32, #tpu.memory_space<vmem>>, vector<1x32xf32>
    %55 = vector.broadcast %54 : vector<1x32xf32> to vector<8x32xf32>
    %56 = arith.mulf %53, %55 : vector<8x32xf32>
    %57 = vector.extract_strided_slice %52 {offsets = [8, 0], sizes = [8, 32], strides = [1, 1]} : vector<32x32xf32> to vector<8x32xf32>
    %c15_33 = arith.constant 15 : index
    %c0_34 = arith.constant 0 : index
    %58 = vector.load %arg7[%c15_33, %c0_34] : memref<18x64xf32, #tpu.memory_space<vmem>>, vector<1x32xf32>
    %59 = vector.broadcast %58 : vector<1x32xf32> to vector<8x32xf32>
    %60 = arith.mulf %57, %59 : vector<8x32xf32>
    %61 = arith.addf %56, %60 : vector<8x32xf32>
    %62 = vector.extract_strided_slice %52 {offsets = [16, 0], sizes = [8, 32], strides = [1, 1]} : vector<32x32xf32> to vector<8x32xf32>
    %c16_35 = arith.constant 16 : index
    %c0_36 = arith.constant 0 : index
    %63 = vector.load %arg7[%c16_35, %c0_36] : memref<18x64xf32, #tpu.memory_space<vmem>>, vector<1x32xf32>
    %64 = vector.broadcast %63 : vector<1x32xf32> to vector<8x32xf32>
    %65 = arith.mulf %62, %64 : vector<8x32xf32>
    %66 = arith.addf %61, %65 : vector<8x32xf32>
    %67 = vector.extract_strided_slice %52 {offsets = [24, 0], sizes = [8, 32], strides = [1, 1]} : vector<32x32xf32> to vector<8x32xf32>
    %c17_37 = arith.constant 17 : index
    %c0_38 = arith.constant 0 : index
    %68 = vector.load %arg7[%c17_37, %c0_38] : memref<18x64xf32, #tpu.memory_space<vmem>>, vector<1x32xf32>
    %69 = vector.broadcast %68 : vector<1x32xf32> to vector<8x32xf32>
    %70 = arith.mulf %67, %69 : vector<8x32xf32>
    %71 = arith.addf %66, %70 : vector<8x32xf32>
    %cst_39 = arith.constant dense<0.000000e+00> : vector<8x32xf32>
    %72 = tpu.matmul %71, %26, %cst_39 {dimension_numbers = #tpu.dot_dimension_numbers<[1], [0], [0], [1], [0, 0, 1, 1], [], []>} : vector<8x32xf32>, vector<32x32xf32>, vector<8x32xf32> -> vector<8x32xf32>
    %73 = vector.broadcast %27 : vector<1x32xf32> to vector<8x32xf32>
    %74 = arith.addf %72, %73 : vector<8x32xf32>
    %75 = arith.addf %1, %74 : vector<8x32xf32>
    %c9 = arith.constant 9 : index
    %c0_40 = arith.constant 0 : index
    %76 = vector.load %arg7[%c9, %c0_40] : memref<18x64xf32, #tpu.memory_space<vmem>>, vector<1x32xf32>
    %c10 = arith.constant 10 : index
    %c0_41 = arith.constant 0 : index
    %77 = vector.load %arg7[%c10, %c0_41] : memref<18x64xf32, #tpu.memory_space<vmem>>, vector<1x32xf32>
    %cst_42 = arith.constant dense<0.000000e+00> : vector<8xf32>
    %78 = vector.multi_reduction <add>, %75, %cst_42 [1] : vector<8x32xf32> to vector<8xf32>
    %79 = vector.shape_cast %78 : vector<8xf32> to vector<8x1xf32>
    %cst_43 = arith.constant 3.200000e+01 : f32
    %80 = vector.broadcast %cst_43 : f32 to vector<8x1xf32>
    %81 = arith.divf %79, %80 : vector<8x1xf32>
    %82 = vector.broadcast %81 : vector<8x1xf32> to vector<8x32xf32>
    %83 = arith.subf %75, %82 : vector<8x32xf32>
    %84 = arith.mulf %83, %83 : vector<8x32xf32>
    %cst_44 = arith.constant dense<0.000000e+00> : vector<8xf32>
    %85 = vector.multi_reduction <add>, %84, %cst_44 [1] : vector<8x32xf32> to vector<8xf32>
    %86 = vector.shape_cast %85 : vector<8xf32> to vector<8x1xf32>
    %cst_45 = arith.constant 3.200000e+01 : f32
    %87 = vector.broadcast %cst_45 : f32 to vector<8x1xf32>
    %88 = arith.divf %86, %87 : vector<8x1xf32>
    %89 = vector.broadcast %81 : vector<8x1xf32> to vector<8x32xf32>
    %90 = arith.subf %75, %89 : vector<8x32xf32>
    %cst_46 = arith.constant 9.99999974E-6 : f32
    %91 = vector.broadcast %cst_46 : f32 to vector<8x1xf32>
    %92 = arith.addf %88, %91 : vector<8x1xf32>
    %93 = math.rsqrt %92 : vector<8x1xf32>
    %94 = vector.broadcast %93 : vector<8x1xf32> to vector<8x32xf32>
    %95 = arith.mulf %90, %94 : vector<8x32xf32>
    %96 = vector.broadcast %76 : vector<1x32xf32> to vector<8x32xf32>
    %97 = arith.mulf %95, %96 : vector<8x32xf32>
    %98 = vector.broadcast %77 : vector<1x32xf32> to vector<8x32xf32>
    %99 = arith.addf %97, %98 : vector<8x32xf32>
    %100 = arith.addf %99, %3 : vector<8x32xf32>
    %c64 = arith.constant 64 : index
    %c0_47 = arith.constant 0 : index
    %101 = vector.load %arg5[%c64, %c0_47] : memref<256x32xf32, #tpu.memory_space<vmem>>, vector<32x32xf32>
    %cst_48 = arith.constant dense<0.000000e+00> : vector<8x32xf32>
    %102 = tpu.matmul %100, %101, %cst_48 {dimension_numbers = #tpu.dot_dimension_numbers<[1], [0], [0], [1], [0, 0, 1, 1], [], []>} : vector<8x32xf32>, vector<32x32xf32>, vector<8x32xf32> -> vector<8x32xf32>
    %c4 = arith.constant 4 : index
    %c0_49 = arith.constant 0 : index
    %103 = vector.load %arg7[%c4, %c0_49] : memref<18x64xf32, #tpu.memory_space<vmem>>, vector<1x32xf32>
    %104 = vector.broadcast %103 : vector<1x32xf32> to vector<8x32xf32>
    %105 = arith.addf %102, %104 : vector<8x32xf32>
    %cst_50 = arith.constant 0.353553385 : f32
    %106 = vector.broadcast %cst_50 : f32 to vector<8x32xf32>
    %107 = arith.mulf %105, %106 : vector<8x32xf32>
    %108 = arith.addf %5, %7 : vector<16x32xf32>
    %c96 = arith.constant 96 : index
    %c0_51 = arith.constant 0 : index
    %109 = vector.load %arg5[%c96, %c0_51] : memref<256x32xf32, #tpu.memory_space<vmem>>, vector<32x32xf32>
    %cst_52 = arith.constant dense<0.000000e+00> : vector<16x32xf32>
    %110 = tpu.matmul %108, %109, %cst_52 {dimension_numbers = #tpu.dot_dimension_numbers<[1], [0], [0], [1], [0, 0, 1, 1], [], []>} : vector<16x32xf32>, vector<32x32xf32>, vector<16x32xf32> -> vector<16x32xf32>
    %c5 = arith.constant 5 : index
    %c0_53 = arith.constant 0 : index
    %111 = vector.load %arg7[%c5, %c0_53] : memref<18x64xf32, #tpu.memory_space<vmem>>, vector<1x32xf32>
    %112 = vector.broadcast %111 : vector<1x32xf32> to vector<16x32xf32>
    %113 = arith.addf %110, %112 : vector<16x32xf32>
    %c128 = arith.constant 128 : index
    %c0_54 = arith.constant 0 : index
    %114 = vector.load %arg5[%c128, %c0_54] : memref<256x32xf32, #tpu.memory_space<vmem>>, vector<32x32xf32>
    %cst_55 = arith.constant dense<0.000000e+00> : vector<16x32xf32>
    %115 = tpu.matmul %5, %114, %cst_55 {dimension_numbers = #tpu.dot_dimension_numbers<[1], [0], [0], [1], [0, 0, 1, 1], [], []>} : vector<16x32xf32>, vector<32x32xf32>, vector<16x32xf32> -> vector<16x32xf32>
    %c6 = arith.constant 6 : index
    %c0_56 = arith.constant 0 : index
    %116 = vector.load %arg7[%c6, %c0_56] : memref<18x64xf32, #tpu.memory_space<vmem>>, vector<1x32xf32>
    %117 = vector.broadcast %116 : vector<1x32xf32> to vector<16x32xf32>
    %118 = arith.addf %115, %117 : vector<16x32xf32>
    %c160 = arith.constant 160 : index
    %c0_57 = arith.constant 0 : index
    %119 = vector.load %arg5[%c160, %c0_57] : memref<256x32xf32, #tpu.memory_space<vmem>>, vector<32x32xf32>
    %c7 = arith.constant 7 : index
    %c0_58 = arith.constant 0 : index
    %120 = vector.load %arg7[%c7, %c0_58] : memref<18x64xf32, #tpu.memory_space<vmem>>, vector<1x32xf32>
    %c14_59 = arith.constant 14 : index
    %c0_60 = arith.constant 0 : index
    %121 = vector.load %arg7[%c14_59, %c0_60] : memref<18x64xf32, #tpu.memory_space<vmem>>, vector<1x32xf32>
    %122 = vector.broadcast %121 : vector<1x32xf32> to vector<8x32xf32>
    %123 = arith.mulf %107, %122 : vector<8x32xf32>
    %c15_61 = arith.constant 15 : index
    %c0_62 = arith.constant 0 : index
    %124 = vector.load %arg7[%c15_61, %c0_62] : memref<18x64xf32, #tpu.memory_space<vmem>>, vector<1x32xf32>
    %125 = vector.broadcast %124 : vector<1x32xf32> to vector<8x32xf32>
    %126 = arith.mulf %107, %125 : vector<8x32xf32>
    %c16_63 = arith.constant 16 : index
    %c0_64 = arith.constant 0 : index
    %127 = vector.load %arg7[%c16_63, %c0_64] : memref<18x64xf32, #tpu.memory_space<vmem>>, vector<1x32xf32>
    %128 = vector.broadcast %127 : vector<1x32xf32> to vector<8x32xf32>
    %129 = arith.mulf %107, %128 : vector<8x32xf32>
    %c17_65 = arith.constant 17 : index
    %c0_66 = arith.constant 0 : index
    %130 = vector.load %arg7[%c17_65, %c0_66] : memref<18x64xf32, #tpu.memory_space<vmem>>, vector<1x32xf32>
    %131 = vector.broadcast %130 : vector<1x32xf32> to vector<8x32xf32>
    %132 = arith.mulf %107, %131 : vector<8x32xf32>
    %133 = tpu.concatenate %123, %126, %129, %132 in 0 : vector<8x32xf32>, vector<8x32xf32>, vector<8x32xf32>, vector<8x32xf32> -> vector<32x32xf32>
    %cst_67 = arith.constant dense<0.000000e+00> : vector<32x16xf32>
    %134 = tpu.matmul %133, %113, %cst_67 {dimension_numbers = #tpu.dot_dimension_numbers<[1], [1], [0], [0], [0, 0, 1, 0], [], []>} : vector<32x32xf32>, vector<16x32xf32>, vector<32x16xf32> -> vector<32x16xf32>
    %cst_68 = arith.constant dense<0xFF800000> : vector<32xf32>
    %135 = vector.multi_reduction <maximumf>, %134, %cst_68 [1] : vector<32x16xf32> to vector<32xf32>
    %136 = vector.shape_cast %135 : vector<32xf32> to vector<32x1xf32>
    %137 = vector.broadcast %136 : vector<32x1xf32> to vector<32x16xf32>
    %138 = arith.subf %134, %137 : vector<32x16xf32>
    %139 = math.exp %138 : vector<32x16xf32>
    %cst_69 = arith.constant dense<0.000000e+00> : vector<32xf32>
    %140 = vector.multi_reduction <add>, %139, %cst_69 [1] : vector<32x16xf32> to vector<32xf32>
    %141 = vector.shape_cast %140 : vector<32xf32> to vector<32x1xf32>
    %142 = tpu.reciprocal %141 : vector<32x1xf32> -> vector<32x1xf32>
    %143 = vector.broadcast %142 : vector<32x1xf32> to vector<32x16xf32>
    %144 = arith.mulf %139, %143 : vector<32x16xf32>
    %cst_70 = arith.constant dense<0.000000e+00> : vector<32x32xf32>
    %145 = tpu.matmul %144, %118, %cst_70 {dimension_numbers = #tpu.dot_dimension_numbers<[1], [0], [0], [1], [0, 0, 1, 1], [], []>} : vector<32x16xf32>, vector<16x32xf32>, vector<32x32xf32> -> vector<32x32xf32>
    %146 = vector.extract_strided_slice %145 {offsets = [0, 0], sizes = [8, 32], strides = [1, 1]} : vector<32x32xf32> to vector<8x32xf32>
    %c14_71 = arith.constant 14 : index
    %c0_72 = arith.constant 0 : index
    %147 = vector.load %arg7[%c14_71, %c0_72] : memref<18x64xf32, #tpu.memory_space<vmem>>, vector<1x32xf32>
    %148 = vector.broadcast %147 : vector<1x32xf32> to vector<8x32xf32>
    %149 = arith.mulf %146, %148 : vector<8x32xf32>
    %150 = vector.extract_strided_slice %145 {offsets = [8, 0], sizes = [8, 32], strides = [1, 1]} : vector<32x32xf32> to vector<8x32xf32>
    %c15_73 = arith.constant 15 : index
    %c0_74 = arith.constant 0 : index
    %151 = vector.load %arg7[%c15_73, %c0_74] : memref<18x64xf32, #tpu.memory_space<vmem>>, vector<1x32xf32>
    %152 = vector.broadcast %151 : vector<1x32xf32> to vector<8x32xf32>
    %153 = arith.mulf %150, %152 : vector<8x32xf32>
    %154 = arith.addf %149, %153 : vector<8x32xf32>
    %155 = vector.extract_strided_slice %145 {offsets = [16, 0], sizes = [8, 32], strides = [1, 1]} : vector<32x32xf32> to vector<8x32xf32>
    %c16_75 = arith.constant 16 : index
    %c0_76 = arith.constant 0 : index
    %156 = vector.load %arg7[%c16_75, %c0_76] : memref<18x64xf32, #tpu.memory_space<vmem>>, vector<1x32xf32>
    %157 = vector.broadcast %156 : vector<1x32xf32> to vector<8x32xf32>
    %158 = arith.mulf %155, %157 : vector<8x32xf32>
    %159 = arith.addf %154, %158 : vector<8x32xf32>
    %160 = vector.extract_strided_slice %145 {offsets = [24, 0], sizes = [8, 32], strides = [1, 1]} : vector<32x32xf32> to vector<8x32xf32>
    %c17_77 = arith.constant 17 : index
    %c0_78 = arith.constant 0 : index
    %161 = vector.load %arg7[%c17_77, %c0_78] : memref<18x64xf32, #tpu.memory_space<vmem>>, vector<1x32xf32>
    %162 = vector.broadcast %161 : vector<1x32xf32> to vector<8x32xf32>
    %163 = arith.mulf %160, %162 : vector<8x32xf32>
    %164 = arith.addf %159, %163 : vector<8x32xf32>
    %cst_79 = arith.constant dense<0.000000e+00> : vector<8x32xf32>
    %165 = tpu.matmul %164, %119, %cst_79 {dimension_numbers = #tpu.dot_dimension_numbers<[1], [0], [0], [1], [0, 0, 1, 1], [], []>} : vector<8x32xf32>, vector<32x32xf32>, vector<8x32xf32> -> vector<8x32xf32>
    %166 = vector.broadcast %120 : vector<1x32xf32> to vector<8x32xf32>
    %167 = arith.addf %165, %166 : vector<8x32xf32>
    %168 = arith.addf %99, %167 : vector<8x32xf32>
    %c11 = arith.constant 11 : index
    %c0_80 = arith.constant 0 : index
    %169 = vector.load %arg7[%c11, %c0_80] : memref<18x64xf32, #tpu.memory_space<vmem>>, vector<1x32xf32>
    %c12 = arith.constant 12 : index
    %c0_81 = arith.constant 0 : index
    %170 = vector.load %arg7[%c12, %c0_81] : memref<18x64xf32, #tpu.memory_space<vmem>>, vector<1x32xf32>
    %cst_82 = arith.constant dense<0.000000e+00> : vector<8xf32>
    %171 = vector.multi_reduction <add>, %168, %cst_82 [1] : vector<8x32xf32> to vector<8xf32>
    %172 = vector.shape_cast %171 : vector<8xf32> to vector<8x1xf32>
    %cst_83 = arith.constant 3.200000e+01 : f32
    %173 = vector.broadcast %cst_83 : f32 to vector<8x1xf32>
    %174 = arith.divf %172, %173 : vector<8x1xf32>
    %175 = vector.broadcast %174 : vector<8x1xf32> to vector<8x32xf32>
    %176 = arith.subf %168, %175 : vector<8x32xf32>
    %177 = arith.mulf %176, %176 : vector<8x32xf32>
    %cst_84 = arith.constant dense<0.000000e+00> : vector<8xf32>
    %178 = vector.multi_reduction <add>, %177, %cst_84 [1] : vector<8x32xf32> to vector<8xf32>
    %179 = vector.shape_cast %178 : vector<8xf32> to vector<8x1xf32>
    %cst_85 = arith.constant 3.200000e+01 : f32
    %180 = vector.broadcast %cst_85 : f32 to vector<8x1xf32>
    %181 = arith.divf %179, %180 : vector<8x1xf32>
    %182 = vector.broadcast %174 : vector<8x1xf32> to vector<8x32xf32>
    %183 = arith.subf %168, %182 : vector<8x32xf32>
    %cst_86 = arith.constant 9.99999974E-6 : f32
    %184 = vector.broadcast %cst_86 : f32 to vector<8x1xf32>
    %185 = arith.addf %181, %184 : vector<8x1xf32>
    %186 = math.rsqrt %185 : vector<8x1xf32>
    %187 = vector.broadcast %186 : vector<8x1xf32> to vector<8x32xf32>
    %188 = arith.mulf %183, %187 : vector<8x32xf32>
    %189 = vector.broadcast %169 : vector<1x32xf32> to vector<8x32xf32>
    %190 = arith.mulf %188, %189 : vector<8x32xf32>
    %191 = vector.broadcast %170 : vector<1x32xf32> to vector<8x32xf32>
    %192 = arith.addf %190, %191 : vector<8x32xf32>
    %c32_87 = arith.constant 32 : index
    %c0_88 = arith.constant 0 : index
    %193 = vector.load %arg6[%c32_87, %c0_88] : memref<64x64xf32, #tpu.memory_space<vmem>>, vector<32x64xf32>
    %cst_89 = arith.constant dense<0.000000e+00> : vector<8x64xf32>
    %194 = tpu.matmul %192, %193, %cst_89 {dimension_numbers = #tpu.dot_dimension_numbers<[1], [0], [0], [1], [0, 0, 1, 1], [], []>} : vector<8x32xf32>, vector<32x64xf32>, vector<8x64xf32> -> vector<8x64xf32>
    %c13 = arith.constant 13 : index
    %c0_90 = arith.constant 0 : index
    %195 = vector.load %arg7[%c13, %c0_90] : memref<18x64xf32, #tpu.memory_space<vmem>>, vector<1x64xf32>
    %196 = vector.broadcast %195 : vector<1x64xf32> to vector<8x64xf32>
    %197 = arith.addf %194, %196 : vector<8x64xf32>
    %cst_91 = arith.constant 0.000000e+00 : f32
    %198 = vector.broadcast %cst_91 : f32 to vector<8x64xf32>
    %199 = arith.maximumf %197, %198 : vector<8x64xf32>
    %c192 = arith.constant 192 : index
    %c0_92 = arith.constant 0 : index
    %200 = vector.load %arg5[%c192, %c0_92] : memref<256x32xf32, #tpu.memory_space<vmem>>, vector<64x32xf32>
    %cst_93 = arith.constant dense<0.000000e+00> : vector<8x32xf32>
    %201 = tpu.matmul %199, %200, %cst_93 {dimension_numbers = #tpu.dot_dimension_numbers<[1], [0], [0], [1], [0, 0, 1, 1], [], []>} : vector<8x64xf32>, vector<64x32xf32>, vector<8x32xf32> -> vector<8x32xf32>
    %c8 = arith.constant 8 : index
    %c0_94 = arith.constant 0 : index
    %202 = vector.load %arg7[%c8, %c0_94] : memref<18x64xf32, #tpu.memory_space<vmem>>, vector<1x32xf32>
    %203 = vector.broadcast %202 : vector<1x32xf32> to vector<8x32xf32>
    %204 = arith.addf %201, %203 : vector<8x32xf32>
    %205 = arith.addf %192, %204 : vector<8x32xf32>
    %c11_95 = arith.constant 11 : index
    %c0_96 = arith.constant 0 : index
    %206 = vector.load %arg7[%c11_95, %c0_96] : memref<18x64xf32, #tpu.memory_space<vmem>>, vector<1x32xf32>
    %c12_97 = arith.constant 12 : index
    %c0_98 = arith.constant 0 : index
    %207 = vector.load %arg7[%c12_97, %c0_98] : memref<18x64xf32, #tpu.memory_space<vmem>>, vector<1x32xf32>
    %cst_99 = arith.constant dense<0.000000e+00> : vector<8xf32>
    %208 = vector.multi_reduction <add>, %205, %cst_99 [1] : vector<8x32xf32> to vector<8xf32>
    %209 = vector.shape_cast %208 : vector<8xf32> to vector<8x1xf32>
    %cst_100 = arith.constant 3.200000e+01 : f32
    %210 = vector.broadcast %cst_100 : f32 to vector<8x1xf32>
    %211 = arith.divf %209, %210 : vector<8x1xf32>
    %212 = vector.broadcast %211 : vector<8x1xf32> to vector<8x32xf32>
    %213 = arith.subf %205, %212 : vector<8x32xf32>
    %214 = arith.mulf %213, %213 : vector<8x32xf32>
    %cst_101 = arith.constant dense<0.000000e+00> : vector<8xf32>
    %215 = vector.multi_reduction <add>, %214, %cst_101 [1] : vector<8x32xf32> to vector<8xf32>
    %216 = vector.shape_cast %215 : vector<8xf32> to vector<8x1xf32>
    %cst_102 = arith.constant 3.200000e+01 : f32
    %217 = vector.broadcast %cst_102 : f32 to vector<8x1xf32>
    %218 = arith.divf %216, %217 : vector<8x1xf32>
    %219 = vector.broadcast %211 : vector<8x1xf32> to vector<8x32xf32>
    %220 = arith.subf %205, %219 : vector<8x32xf32>
    %cst_103 = arith.constant 9.99999974E-6 : f32
    %221 = vector.broadcast %cst_103 : f32 to vector<8x1xf32>
    %222 = arith.addf %218, %221 : vector<8x1xf32>
    %223 = math.rsqrt %222 : vector<8x1xf32>
    %224 = vector.broadcast %223 : vector<8x1xf32> to vector<8x32xf32>
    %225 = arith.mulf %220, %224 : vector<8x32xf32>
    %226 = vector.broadcast %206 : vector<1x32xf32> to vector<8x32xf32>
    %227 = arith.mulf %225, %226 : vector<8x32xf32>
    %228 = vector.broadcast %207 : vector<1x32xf32> to vector<8x32xf32>
    %229 = arith.addf %227, %228 : vector<8x32xf32>
    %c0_104 = arith.constant 0 : index
    %c0_105 = arith.constant 0 : index
    %c0_106 = arith.constant 0 : index
    %230 = vector.load %arg8[%c0_104, %c0_105, %c0_106] : memref<1x8x32xf32, #tpu.memory_space<vmem>>, vector<1x8x32xf32>
    %231 = vector.shape_cast %230 : vector<1x8x32xf32> to vector<8x32xf32>
    %232 = vector.shape_cast %229 : vector<8x32xf32> to vector<1x8x32xf32>
    tpu.vector_store %arg8[%c0_104, %c0_105, %c0_106], %232 {strides = array<i32>} : memref<1x8x32xf32, #tpu.memory_space<vmem>>, vector<1x8x32xf32>,
    return
  }
  func.func @transform_0(%arg0: i32) -> (i32, i32, i32) {
    %c0_i32 = arith.constant 0 : i32
    %c0_i32_0 = arith.constant 0 : i32
    %c0_i32_1 = arith.constant 0 : i32
    return %arg0, %c0_i32, %c0_i32_0 : i32, i32, i32
  }
  func.func @transform_1(%arg0: i32) -> (i32, i32, i32) {
    %c0_i32 = arith.constant 0 : i32
    %c0_i32_0 = arith.constant 0 : i32
    %c0_i32_1 = arith.constant 0 : i32
    return %arg0, %c0_i32, %c0_i32_0 : i32, i32, i32
  }
  func.func @transform_2(%arg0: i32) -> (i32, i32, i32) {
    %c0_i32 = arith.constant 0 : i32
    %c0_i32_0 = arith.constant 0 : i32
    %c0_i32_1 = arith.constant 0 : i32
    return %arg0, %c0_i32, %c0_i32_0 : i32, i32, i32
  }
  func.func @transform_3(%arg0: i32) -> (i32, i32, i32) {
    %c0_i32 = arith.constant 0 : i32
    %c0_i32_0 = arith.constant 0 : i32
    %c0_i32_1 = arith.constant 0 : i32
    return %arg0, %c0_i32, %c0_i32_0 : i32, i32, i32
  }
  func.func @transform_4(%arg0: i32) -> (i32, i32) {
    %c0_i32 = arith.constant 0 : i32
    %c0_i32_0 = arith.constant 0 : i32
    %c0_i32_1 = arith.constant 0 : i32
    return %c0_i32, %c0_i32_0 : i32, i32
  }
  func.func @transform_5(%arg0: i32) -> (i32, i32) {
    %c0_i32 = arith.constant 0 : i32
    %c0_i32_0 = arith.constant 0 : i32
    %c0_i32_1 = arith.constant 0 : i32
    return %c0_i32, %c0_i32_0 : i32, i32
  }
  func.func @transform_6(%arg0: i32) -> (i32, i32) {
    %c0_i32 = arith.constant 0 : i32
    %c0_i32_0 = arith.constant 0 : i32
    %c0_i32_1 = arith.constant 0 : i32
    return %c0_i32, %c0_i32_0 : i32, i32
  }
  func.func @transform_7(%arg0: i32) -> (i32, i32, i32) {
    %c0_i32 = arith.constant 0 : i32
    %c0_i32_0 = arith.constant 0 : i32
    %c0_i32_1 = arith.constant 0 : i32
    return %arg0, %c0_i32, %c0_i32_0 : i32, i32, i32
  }
}

</mosaic_0001>

<bundles_post_ra>
// kernel: transformer_decoder_layer.1
= control target key start
LH: loop header
LB: loop body
LE: loop exit
PB: predicated region body
PF: predicated region fallthrough
CT: control target
= control target key end

     0   :  { %12 = vsyncpa [#allocation3], 0  ;;  %s2779_s0 = inlined_call_operand.vmem [shape: f32[2,8,32], index: 0, kind: input, shape index: {}]   ;;  %s2780_s1 = inlined_call_operand.vmem [shape: f32[2,8,32], index: 1, kind: input, shape index: {}]   ;;  %s2781_s2 = inlined_call_operand.vmem [shape: f32[2,16,32], index: 2, kind: input, shape index: {}]   ;;  %s2782_s3 = inlined_call_operand.vmem [shape: f32[2,16,32], index: 3, kind: input, shape index: {}]   ;;  %s2783_s4 = inlined_call_operand.vmem [shape: f32[256,32], index: 4, kind: input, shape index: {}]   ;;  %s2784_s5 = inlined_call_operand.vmem [shape: f32[64,64], index: 5, kind: input, shape index: {}]   ;;  %s2785_s6 = inlined_call_operand.vmem [shape: f32[18,64], index: 6, kind: input, shape index: {}]   ;;  %s2786_s7 = inlined_call_operand.hbm [shape: f32[2,8,32], index: 7, kind: output, shape index: {}]  }
   0x1   :  { %14 = vsyncpa [#allocation3 + $0x1], 0  ;;  %s2372_s24 = smov 0   ;;  %s2374_s25 = smov 0  }
   0x2   :  { %s2376_s26 = smov 0   ;;  %s2378_s27 = smov 0  }
   0x3 LB: > { %s2393_s28 = sadd.s32 4294967295, %s2324_s27   ;;  %s1825_s29 = sadd.s32 4294967294, %s2324_s27   ;;  %s2324_s27 = sphi %s2378_s27, %s2792_s27   ;;  %s2320_s26 = sphi %s2376_s26, %s2791_s26   ;;  %s2316_s25 = sphi %s2374_s25, %s2790_s25   ;;  %s2312_s24 = sphi %s2372_s24, %s2789_s24  }
   0x4   : > { %s2397_s30 = sadd.s32 1, %s2324_s27   ;;  %s194_s8 = sadd.s32 1, %s2320_s26 }
   0x5   : > { %s191_s9 = ssub.s32 %s2324_s27, %s2397_s30  ;;  %p204_p0 = scmp.ne.s32.totalorder %s2320_s26, %s2316_s25 }
   0x6   : > { %p192_p1 = scmp.eq.s32.totalorder %s191_s9, 0  ;;  %p205_p2 = scmp.eq.s32.totalorder %s2393_s28, 1 }
   0x7   : > { %p210_p3 = scmp.ne.s32.totalorder %s2316_s25, %s2312_s24  ;;  %p211_p4 = scmp.eq.s32.totalorder %s1825_s29, 1 }
   0x8   : > { %s2408_s10 = scalar_select %p192_p1, %s2320_s26, %s194_s8  }
   0x9   : > { %p2410_p5 = por %p205_p2, %p204_p0  ;;  %p2414_p6 = por %p211_p4, %p210_p3 }
   0xa   : > { %p1828_p7 = scmp.ge.s32.totalorder %s2324_s27, 1  ;;  %p268_p8 = scmp.lt.s32.totalorder %s2324_s27, 3 }
   0xc   : > { %p269_p9 = pnand %p1828_p7, %p268_p8 }
   0xd   : > { %v338_v0 = vld [vmem:[%s2784_s5] sm:$0xff] (!%p269_p9)  ;;  %v339_v1 = vld [vmem:[%s2784_s5 + $0x8] sm:$0xff] (!%p269_p9)  ;;  %v340_v2 = vld [vmem:[%s2784_s5 + $0x10] sm:$0xff] (!%p269_p9)  ;;  %v2326_v3 = vmov (!%p269_p9), 0.0|0.0   ;;  %vm2327_vm0 = vmmov (!%p269_p9), 0   ;;  %v2328_v6 = vmov (!%p269_p9), 0.0  }
   0xe   : > { %272 = sbr.rel (%p269_p9) target bundleno = 3913 (0xf49), region = 48  ;;  %2106 = vmatprep.subr.bf16.mxu0 (!%p269_p9), %v2326_v3  ;;  %v2107_v4 = vpack.c.bf16 (!%p269_p9), %v339_v1, %v338_v0  ;;  %v341_v5 = vld [vmem:[%s2784_s5 + $0x18] sm:$0xff] (!%p269_p9)  ;;  %1971 = vmatprep.mubr.msk.f32.mxu0 (!%p269_p9), %vm2327_vm0, %v2328_v6  ;;  %p313_p10 = scmp.lt.s32.totalorder (!%p269_p9), %s2393_s28, 1  ;;  %v1838_v7 = vld [vmem:[%s2785_s6 + $0x1] ss:$0 sm:$0xff] (!%p269_p9)  ;;  %v434_v10 = vld [vmem:[%s2783_s4 + $0x8] sm:$0xff] (!%p269_p9) }
   0xf   : > { %s2329_s23 = smov (!%p269_p9), 32   ;;  %v2110_v8 = vpack.c.bf16 (!%p269_p9), %v341_v5, %v340_v2  ;;  %v433_v9 = vld [vmem:[%s2783_s4] sm:$0xff] (!%p269_p9)  ;;  %vm342_vm1 = vcmask (!%p269_p9), 261120   ;;  %v435_v15 = vld [vmem:[%s2783_s4 + $0x10] sm:$0xff] (!%p269_p9)  ;;  %v436_v16 = vld [vmem:[%s2783_s4 + $0x18] sm:$0xff] (!%p269_p9)  ;;  %s2330_s17 = smov (!%p269_p9), 96  }
  0x10   : > { %429 = vrot.lane.b32.xlu0 (!%p269_p9), %v1838_v7, %s2329_s23  ;;  %2108 = vmatpush3.bf16.msra.mxu0 (!%p269_p9), %v2107_v4  ;;  %v2113_v13 = vpack.c.bf16 (!%p269_p9), %v434_v10, %v433_v9  ;;  %v2116_v17 = vpack.c.bf16 (!%p269_p9), %v436_v16, %v435_v15  ;;  %v1837_v19 = vld [vmem:[%s2785_s6] ss:$0 sm:$0xff] (!%p269_p9)  ;;  %v2481_v24 = vld [vmem:[%s2785_s6 + $0xe] ss:$0 sm:$0xff] (!%p269_p9)  ;;  %v1839_v27 = vld [vmem:[%s2785_s6 + $0x2] ss:$0 sm:$0xff] (!%p269_p9) }
  0x11   : > { %2109 = vmatprep.subr.bf16.mxu0 (!%p269_p9), %v2326_v3  ;;  %v2492_v31 = vld [vmem:[%s2785_s6 + $0xf] ss:$0 sm:$0xff] (!%p269_p9)  ;;  %v2498_v33 = vld [vmem:[%s2785_s6 + $0x10] ss:$0 sm:$0xff] (!%p269_p9)  ;;  %v2507_v36 = vld [vmem:[%s2785_s6 + $0x11] ss:$0 sm:$0xff] (!%p269_p9) }
  0x12   : > { %vm646_vm2 = vcmask (!%p269_p9), 64512   ;;  %vm2147_vm3 = vmpackc.low (!%p269_p9), %vm342_vm1, %vm342_vm1  ;;  %vm1277_vm4 = vcmask (!%p269_p9), 130048   ;;  %vm1625_vm5 = vcmask (!%p269_p9), 523264   ;;  %s310_s23 = sand.u32 (!%p269_p9), 1, %s2316_s25   ;;  %s1885_s9 = sshll.u32 (!%p269_p9), %s2393_s28, 7 }
  0x13   : > { %s2736_s16 = scalar_lea.hbm (!%p269_p9), %s2786_s7, %s1885_s9 }
  0x14   : > { %2111 = vmatpush3.bf16.msra.mxu0 (!%p269_p9), %v2110_v8 }
  0x15   : > { %s2440_s29 = scalar_select %p313_p10, %s2393_s28, 1  ;;  %2112 = vmatprep.subr.bf16.mxu0 %v2326_v3 }
  0x16   : > { %s2331_s28 = smov [#allocation2]  }
  0x17   : > { %s1830_s15 = sshll.u32 %s2440_s29, 3  ;;  %s2266_s19 = sshll.u32 %s2331_s28, 4  ;;  %s2267_s19 = int_to_ptr.vmem [resolvable:$false] %s2266_s19 }
  0x18   : > { %s316_s18 = scalar_lea.vmem %s2779_s0, %s1830_s15  ;;  %s320_s21 = scalar_lea.vmem %s2780_s1, %s1830_s15 }
  0x19   : > { %v2456_v11 = vld [vmem:[%s316_s18] sm:$0xff]  ;;  %s1888_s18 = sshll.u32 %s2440_s29, 4  ;;  %s2268_s20 = scalar_lea.vmem %s2267_s19, 256 }
  0x1a   : > { %v2458_v12 = vld [vmem:[%s320_s21] sm:$0xff]  ;;  %s325_s21 = scalar_lea.vmem %s2781_s2, %s1888_s18  ;;  %s330_s8 = scalar_lea.vmem %s2782_s3, %s1888_s18 }
  0x1b   : > { %v337_v14 = vadd.f32 %v2458_v12, %v2456_v11 }
  0x1d   : > { %1972 = vmatmul.mubr.msk.f32.vlgmr.msra.gmra.mrb[0].mxu0 %vm342_vm1, %v337_v14 }
  0x1e   : > { %2114 = vmatpush3.bf16.msra.mxu0 %v2113_v13  ;;  %1982 = vmatprep.mubr.msk.f32.mxu0 %vm2327_vm0, %v2328_v6 }
  0x1f   : > { %2115 = vmatprep.subr.bf16.mxu0 %v2326_v3 }
  0x22   : > { %2117 = vmatpush3.bf16.msra.mxu0 %v2116_v17 }
  0x25   : > { %1983 = vmatmul.mubr.msk.f32.vlgmr.msra.gmra.mrb[2].mxu0 %vm342_vm1, %v2456_v11 }
  0x82   : > { %v430_v18 = vpop.permute.xlu0 %429 }
  0xf0   : > { %v412_v20 = vpop.f32.mrb[0].mxu0 }
  0xf1   : > { %v421_v21 = vadd.f32 %v1837_v19, %v412_v20  ;;  %v432_v22 = vadd.f32 %v430_v18, %v412_v20  ;;  %v1973_v23 = vpop.f32.mrb[1].mxu0  ;;  %v515_v18 = vld [vmem:[%s2783_s4 + $0x20] sm:$0xff]  ;;  %v516_v19 = vld [vmem:[%s2783_s4 + $0x28] sm:$0xff] }
  0xf2   : > { %v2119_v20 = vpack.c.bf16 %v516_v19, %v515_v18 }
  0xf3   : > { %v422_v25 = vmul.f32 0.35355338, %v421_v21  ;;  %545 = vrot.lane.b32.xlu0 %v432_v22, %s2330_s17  ;;  %v517_v21 = vld [vmem:[%s2783_s4 + $0x30] sm:$0xff]  ;;  %v518_v22 = vld [vmem:[%s2783_s4 + $0x38] sm:$0xff]  ;;  %s1717_s17 = scalar_lea.sflag [#allocation3], %s310_s23 }
  0xf4   : > { %v2122_v23 = vpack.c.bf16 %v518_v22, %v517_v21 }
  0xf5   : > { %v525_v26 = vmul.f32 %v2481_v24, %v422_v25  ;;  %v531_v34 = vmul.f32 %v2492_v31, %v422_v25  ;;  %v537_v35 = vmul.f32 %v2498_v33, %v422_v25  ;;  %v543_v37 = vmul.f32 %v2507_v36, %v422_v25 }
  0xf7   : > { %1987 = vmatprep.mubr.msk.f32.mxu0 %vm342_vm1, %v525_v26 }
  0xf8   : > { %v511_v28 = vpop.f32.mrb[2].mxu0 }
  0xf9   : > { %v512_v29 = vadd.f32 %v1839_v27, %v511_v28  ;;  %v1984_v30 = vpop.f32.mrb[3].mxu0 }
  0xfb   : > { %1993 = vmatprep.subr.mxu1 %v512_v29 }
  0xfc   : > { %1994 = vmatpush3.msra.mxu1 %v512_v29 }
  0xfd   : > { %2124 = vmatprep.subr.bf16.mxu1 %v2326_v3 }
 0x165   : > { %v546_v32 = vpop.permute.xlu0 %545 }
 0x166   : > { %1985 = vmatprep.subr.msk.mxu0 %vm342_vm1, %v546_v32 }
 0x167   : > { %1986 = vmatpush3.xpose.msk.msra.mxu0 %vm342_vm1, %v546_v32 }
 0x168   : > { %2118 = vmatprep.subr.bf16.mxu0 %v2326_v3 }
 0x16a   : > { %1988 = vmatmul.mubr.msk.f32.vlgmr.msra.gmra.mrb[4].mxu0 %vm342_vm1, %v531_v34 }
 0x16b   : > { %1990 = vmatprep.mubr.msk.f32.mxu0 %vm342_vm1, %v537_v35  ;;  %2120 = vmatpush3.bf16.msra.mxu0 %v2119_v20 }
 0x16c   : > { %2121 = vmatprep.subr.bf16.mxu0 %v2326_v3 }
 0x16e   : > { %1991 = vmatmul.mubr.msk.f32.gmra.mrb[6].mxu0 %vm342_vm1, %v543_v37 }
 0x16f   : > { %2009 = vmatprep.mubr.msk.f32.mxu0 %vm2327_vm0, %v2328_v6  ;;  %2123 = vmatpush3.bf16.msra.mxu0 %v2122_v23 }
 0x23d   : > { %v1989_v38 = vpop.f32.mrb[4].mxu0 }
 0x23e   : > { %v627_v39 = vpop.f32.mrb[5].mxu0  ;;  %v650_v43 = vsel %vm646_vm2, %v1989_v38, -inf }
 0x23f   : > { %v647_v40 = vsel %vm646_vm2, %v627_v39, -inf }
 0x240   : > { %648 = vmax.xlane.f32.xlu1 %v647_v40 }
 0x241   : > { %v1992_v41 = vpop.f32.mrb[6].mxu0 }
 0x242   : > { %v637_v42 = vpop.f32.mrb[7].mxu0  ;;  %v656_v45 = vsel %vm646_vm2, %v1992_v41, -inf }
 0x243   : > { %v653_v44 = vsel %vm646_vm2, %v637_v42, -inf }
 0x244   : > { %651 = vmax.xlane.f32.xlu1 %v650_v43  ;;  %654 = vmax.xlane.f32.xlu0 %v653_v44 }
 0x248   : > { %657 = vmax.xlane.f32.xlu1 %v656_v45 }
 0x2cd   : > { %v649_v46 = vpop.xlane.xlu1 %648 }
 0x2ce   : > { %v659_v47 = vsub.f32 %v627_v39, %v649_v46  ;;  %v1854_v39 = vld [vmem:[%s2785_s6 + $0x3] ss:$0 sm:$0xff] }
 0x2d0   : > { %v663_v51 = vmul.f32 1.442695, %v659_v47 }
 0x2d1   : > { %v652_v48 = vpop.xlane.xlu1 %651  ;;  %v655_v49 = vpop.xlane.xlu0 %654 }
 0x2d2   : > { %v660_v50 = vsub.f32 %v1989_v38, %v652_v48  ;;  %v661_v53 = vsub.f32 %v637_v42, %v655_v49 }
 0x2d4   : > { %v665_v52 = vmul.f32 1.442695, %v660_v50  ;;  %v667_v55 = vmul.f32 1.442695, %v661_v53  ;;  %v985_v50 = vld [vmem:[%s2783_s4 + $0x60] sm:$0xff]  ;;  %v988_v53 = vld [vmem:[%s2783_s4 + $0x78] sm:$0xff] }
 0x2d5   : > { %v658_v54 = vpop.xlane.xlu1 %657 }
 0x2d6   : > { %2224 = vpow2.f32 %v665_v52  ;;  %v662_v56 = vsub.f32 %v1992_v41, %v658_v54  ;;  %v987_v52 = vld [vmem:[%s2783_s4 + $0x70] sm:$0xff] }
 0x2d7   : > { %2226 = vpow2.f32 %v663_v51  ;;  %v986_v51 = vld [vmem:[%s2783_s4 + $0x68] sm:$0xff]  ;;  %v2134_v54 = vpack.c.bf16 %v988_v53, %v987_v52 }
 0x2d8   : > { %2228 = vpow2.f32 %v667_v55  ;;  %v669_v57 = vmul.f32 1.442695, %v662_v56  ;;  %v333_v55 = vld [vmem:[%s325_s21] sm:$0xff] }
 0x2d9   : > { %v335_v56 = vld [vmem:[%s330_s8] sm:$0xff] }
 0x2da   : > { %2230 = vpow2.f32 %v669_v57  ;;  %v334_v57 = vld [vmem:[%s325_s21 + $0x8] sm:$0xff] }
 0x2e0   : > { %v2225_v58 = vpop.eup %2224 }
 0x2e1   : > { %v674_v59 = vsel %vm646_vm2, %v2225_v58, 0.0  ;;  %v2227_v60 = vpop.eup %2226 }
 0x2e2   : > { %675 = vadd.xlane.f32.xlu1 %v674_v59  ;;  %v671_v61 = vsel %vm646_vm2, %v2227_v60, 0.0  ;;  %v2229_v62 = vpop.eup %2228  ;;  %v983_v59 = vadd.f32 %v335_v56, %v333_v55 }
 0x2e3   : > { %v677_v63 = vsel %vm646_vm2, %v2229_v62, 0.0 }
 0x2e4   : > { %v2231_v0 = vpop.eup %2230 }
 0x2e5   : > { %v680_v1 = vsel %vm646_vm2, %v2231_v0, 0.0 }
 0x2e6   : > { %672 = vadd.xlane.f32.xlu1 %v671_v61  ;;  %v900_v61 = vld [vmem:[%s2783_s4 + $0x40] sm:$0xff] }
 0x2ea   : > { %678 = vadd.xlane.f32.xlu1 %v677_v63 }
 0x2ee   : > { %681 = vadd.xlane.f32.xlu1 %v680_v1  ;;  %v903_v1 = vld [vmem:[%s2783_s4 + $0x58] sm:$0xff] }
 0x36f   : > { %v676_v2 = vpop.xlane.xlu1 %675 }
 0x370   : > { %2232 = vrcp.f32 %v676_v2 }
 0x373   : > { %v673_v4 = vpop.xlane.xlu1 %672 }
 0x374   : > { %2234 = vrcp.f32 %v673_v4 }
 0x377   : > { %v679_v5 = vpop.xlane.xlu1 %678 }
 0x378   : > { %2236 = vrcp.f32 %v679_v5 }
 0x37a   : > { %v2233_v8 = vpop.eup %2232 }
 0x37b   : > { %v682_v7 = vpop.xlane.xlu1 %681  ;;  %v688_v13 = vmul.f32 %v2233_v8, %v2225_v58  ;;  %v336_v58 = vld [vmem:[%s330_s8 + $0x8] sm:$0xff]  ;;  %s1829_s8 = sshll.u32 %s310_s23, 3 }
 0x37c   : > { %2238 = vrcp.f32 %v682_v7  ;;  %s312_s13 = scalar_lea.vmem [#allocation2], %s1829_s8 }
 0x37d   : > { %s1730_s29 = sshll.u32 %s312_s13, 4  ;;  %s2738_s29 = int_to_ptr.vmem [resolvable:$true] %s1730_s29 }
 0x37e   : > { %v2235_v9 = vpop.eup %2234  ;;  %s2262_s18 = scalar_lea.vmem %s2738_s29, 128  ;;  %p2269_p0 = scmp.lt.s32.totalorder %s2738_s29, %s2267_s19 }
 0x37f   : > { %v687_v10 = vmul.f32 %v2235_v9, %v2227_v60  ;;  %v984_v60 = vadd.f32 %v336_v58, %v334_v57  ;;  %v1856_v9 = vld [vmem:[%s2785_s6 + $0x9] ss:$0 sm:$0xff]  ;;  %p2263_p11 = scmp.ne.s32.totalorder %s2738_s29, %s2262_s18  ;;  %p2270_p1 = scmp.lt.s32.totalorder %s2268_s20, %s2262_s18 }
 0x381   : > { %1995 = vmatprep.mubr.msk.f32.mxu1 %vm646_vm2, %v687_v10  ;;  %p2264_p12 = pnand %p2263_p11, %p2410_p5  ;;  %p2271_p2 = por %p2270_p1, %p2269_p0 }
 0x382   : > { %v2237_v14 = vpop.eup %2236  ;;  %1996 = vmatmul.mubr.msk.f32.vlgmr.msra.gmra.mrb[0].mxu1 %vm646_vm2, %v688_v13  ;;  %v1857_v13 = vld [vmem:[%s2785_s6 + $0xa] ss:$0 sm:$0xff] }
 0x383   : > { %v689_v15 = vmul.f32 %v2237_v14, %v2229_v62  ;;  %v901_v62 = vld [vmem:[%s2783_s4 + $0x48] sm:$0xff]  ;;  %p2265_p13 = pneg %p2264_p12 }
 0x384   : > { %v2125_v63 = vpack.c.bf16 %v901_v62, %v900_v61 }
 0x385   : > { %1998 = vmatprep.mubr.msk.f32.mxu1 %vm646_vm2, %v689_v15  ;;  %p2272_p3 = pnand %p2271_p2, %p2265_p13 }
 0x386   : > { %v2239_v16 = vpop.eup %2238  ;;  %2126 = vmatpush3.bf16.msra.mxu1 %v2125_v63 }
 0x387   : > { %v690_v17 = vmul.f32 %v2239_v16, %v2231_v0  ;;  %2127 = vmatprep.subr.bf16.mxu1 %v2326_v3  ;;  %v902_v0 = vld [vmem:[%s2783_s4 + $0x50] sm:$0xff] }
 0x388   : > { %v2128_v2 = vpack.c.bf16 %v903_v1, %v902_v0 }
 0x389   : > { %1999 = vmatmul.mubr.msk.f32.gmra.mrb[2].mxu1 %vm646_vm2, %v690_v17  ;;  %v1860_v17 = vld [vmem:[%s2785_s6 + $0x5] ss:$0 sm:$0xff] }
 0x38a   : > { %2020 = vmatprep.mubr.msk.f32.mxu1 %vm2327_vm0, %v2328_v6  ;;  %2129 = vmatpush3.bf16.msra.mxu1 %v2128_v2 }
 0x455   : > { %v1997_v25 = vpop.f32.mrb[0].mxu1 }
 0x456   : > { %v789_v26 = vmul.f32 %v1997_v25, %v2492_v31  ;;  %v769_v27 = vpop.f32.mrb[1].mxu1 }
 0x457   : > { %v788_v28 = vmul.f32 %v2481_v24, %v769_v27 }
 0x459   : > { %v790_v29 = vadd.f32 %v789_v26, %v788_v28 }
 0x45c   : > { %v2000_v30 = vpop.f32.mrb[2].mxu1 }
 0x45d   : > { %v779_v32 = vpop.f32.mrb[3].mxu1  ;;  %v793_v35 = vmul.f32 %v2000_v30, %v2507_v36 }
 0x45e   : > { %v791_v34 = vmul.f32 %v2498_v33, %v779_v32 }
 0x460   : > { %v792_v37 = vadd.f32 %v791_v34, %v790_v29  ;;  %v1075_v34 = vld [vmem:[%s2783_s4 + $0x80] sm:$0xff] }
 0x462   : > { %v794_v38 = vadd.f32 %v793_v35, %v792_v37  ;;  %v1076_v35 = vld [vmem:[%s2783_s4 + $0x88] sm:$0xff]  ;;  %v1077_v37 = vld [vmem:[%s2783_s4 + $0x90] sm:$0xff] }
 0x464   : > { %2010 = vmatmul.mubr.msk.f32.vlgmr.msra.gmra.mrb[8].mxu0 %vm342_vm1, %v794_v38  ;;  %v2138_v38 = vpack.c.bf16 %v1076_v35, %v1075_v34 }
 0x465   : > { %2031 = vmatprep.mubr.msk.f32.mxu0 %vm342_vm1, %v983_v59 }
 0x466   : > { %2139 = vmatprep.subr.bf16.mxu1 %v2138_v38 }
 0x537   : > { %v868_v40 = vpop.f32.mrb[8].mxu0 }
 0x538   : > { %v869_v41 = vadd.f32 %v1854_v39, %v868_v40  ;;  %v2011_v42 = vpop.f32.mrb[9].mxu0  ;;  %v1078_v39 = vld [vmem:[%s2783_s4 + $0x98] sm:$0xff] }
 0x539   : > { %v2142_v40 = vpack.c.bf16 %v1078_v39, %v1077_v37 }
 0x53a   : > { %v872_v43 = vadd.f32 %v869_v41, %v2456_v11  ;;  %v2130_v11 = vpack.c.bf16 %v986_v51, %v985_v50 }
 0x53c   : > { %v875_v44 = vsel %vm342_vm1, %v872_v43, 0.0  ;;  %2131 = vmatprep.subr.bf16.mxu0 %v2130_v11 }
 0x53d   : > { %876 = vadd.xlane.f32.xlu1 %v875_v44  ;;  %2133 = vmatpush3.bf16.msra.mxu0 %v2130_v11 }
 0x53e   : > { %2135 = vmatprep.subr.bf16.mxu0 %v2134_v54 }
 0x541   : > { %2137 = vmatpush3.bf16.msra.mxu0 %v2134_v54 }
 0x544   : > { %2032 = vmatmul.mubr.msk.f32.vlgmr.msra.gmra.mrb[10].mxu0 %vm342_vm1, %v984_v60 }
 0x5ca   : > { %v877_v45 = vpop.xlane.xlu1 %876 }
 0x5cb   : > { %v879_v46 = vmul.f32 0.03125, %v877_v45 }
 0x5cd   : > { %v880_v47 = vsub.f32 %v872_v43, %v879_v46 }
 0x5cf   : > { %v881_v48 = vmul.f32 %v880_v47, %v880_v47 }
 0x5d1   : > { %v882_v49 = vsel %vm342_vm1, %v881_v48, 0.0 }
 0x5d2   : > { %883 = vadd.xlane.f32.xlu1 %v882_v49 }
 0x617   : > { %v2033_v18 = vpop.f32.mrb[10].mxu0 }
 0x618   : > { %v1072_v19 = vadd.f32 %v2033_v18, %v1860_v17  ;;  %v1066_v20 = vpop.f32.mrb[11].mxu0 }
 0x619   : > { %v1067_v21 = vadd.f32 %v1860_v17, %v1066_v20 }
 0x61b   : > { %v2146_v22 = vpack.c.bf16 %v1072_v19, %v1067_v21 }
 0x61d   : > { %2148 = vmatprep.subr.msk.bf16.mxu0 %vm2147_vm3, %v2146_v22 }
 0x61e   : > { %2151 = vmatpush3.bf16.xpose.msk.msra.mxu0 %vm2147_vm3, %v2146_v22 }
 0x61f   : > { %2162 = vmatprep.subr.bf16.mxu0 %v2326_v3 }
 0x65f   : > { %v884_v4 = vpop.xlane.xlu1 %883 }
 0x660   : > { %v885_v5 = vmul.f32 0.03125, %v884_v4 }
 0x662   : > { %v886_v7 = vadd.f32 1e-05, %v885_v5 }
 0x664   : > { %2240 = vrsqrt.f32 %v886_v7  ;;  %v1863_v7 = vld [vmem:[%s2785_s6 + $0x6] ss:$0 sm:$0xff] }
 0x66e   : > { %v2241_v8 = vpop.eup %2240 }
 0x66f   : > { %v888_v10 = vmul.f32 %v2241_v8, %v880_v47 }
 0x671   : > { %v893_v14 = vmul.f32 %v1856_v9, %v888_v10 }
 0x673   : > { %v2593_v15 = vadd.f32 %v1857_v13, %v893_v14 }
 0x675   : > { %v899_v16 = vadd.f32 %v2593_v15, %v2458_v12  ;;  %v1858_v12 = vld [vmem:[%s2785_s6 + $0x4] ss:$0 sm:$0xff] }
 0x677   : > { %2021 = vmatmul.mubr.msk.f32.vlgmr.msra.gmra.mrb[4].mxu1 %vm342_vm1, %v899_v16 }
 0x678   : > { %2042 = vmatprep.mubr.msk.f32.mxu1 %vm342_vm1, %v333_v55  ;;  %2141 = vmatpush3.bf16.msra.mxu1 %v2138_v38 }
 0x679   : > { %2143 = vmatprep.subr.bf16.mxu1 %v2142_v40 }
 0x67c   : > { %2145 = vmatpush3.bf16.msra.mxu1 %v2142_v40 }
 0x67f   : > { %2043 = vmatmul.mubr.msk.f32.vlgmr.msra.gmra.mrb[6].mxu1 %vm342_vm1, %v334_v57 }
 0x74a   : > { %v978_v23 = vpop.f32.mrb[4].mxu1 }
 0x74b   : > { %v979_v25 = vadd.f32 %v1858_v12, %v978_v23  ;;  %v2022_v26 = vpop.f32.mrb[5].mxu1 }
 0x74d   : > { %v982_v27 = vmul.f32 0.35355338, %v979_v25 }
 0x74f   : > { %v1171_v28 = vmul.f32 %v2492_v31, %v982_v27  ;;  %v1170_v29 = vmul.f32 %v2481_v24, %v982_v27  ;;  %v1172_v30 = vmul.f32 %v2498_v33, %v982_v27  ;;  %v1173_v32 = vmul.f32 %v2507_v36, %v982_v27  ;;  %v1165_v27 = vld [vmem:[%s2783_s4 + $0xa0] sm:$0xff] }
 0x751   : > { %2049 = vmatprep.mubr.msk.f32.mxu0 %vm342_vm1, %v1170_v29 }
 0x752   : > { %2050 = vmatmul.mubr.msk.f32.vlgmr.msra.gmra.mrb[12].mxu0 %vm342_vm1, %v1171_v28  ;;  %v2044_v5 = vpop.f32.mrb[6].mxu1  ;;  %v1166_v28 = vld [vmem:[%s2783_s4 + $0xa8] sm:$0xff] }
 0x753   : > { %2052 = vmatprep.mubr.msk.f32.mxu0 %vm342_vm1, %v1172_v30  ;;  %v1156_v8 = vpop.f32.mrb[7].mxu1  ;;  %v1162_v9 = vadd.f32 %v2044_v5, %v1863_v7  ;;  %v2157_v29 = vpack.c.bf16 %v1166_v28, %v1165_v27  ;;  %v1167_v30 = vld [vmem:[%s2783_s4 + $0xb0] sm:$0xff] }
 0x754   : > { %v1157_v10 = vadd.f32 %v1863_v7, %v1156_v8  ;;  %v1878_v8 = vld [vmem:[%s2785_s6 + $0xb] ss:$0 sm:$0xff] }
 0x756   : > { %2053 = vmatmul.mubr.msk.f32.gmra.mrb[14].mxu0 %vm342_vm1, %v1173_v32  ;;  %v2152_v13 = vpack.c.bf16 %v1162_v9, %v1157_v10  ;;  %v1168_v32 = vld [vmem:[%s2783_s4 + $0xb8] sm:$0xff]  ;;  %v1879_v10 = vld [vmem:[%s2785_s6 + $0xc] ss:$0 sm:$0xff] }
 0x757   : > { %2084 = vmatprep.mubr.msk.f32.mxu0 %vm2327_vm0, %v2328_v6  ;;  %v2160_v34 = vpack.c.bf16 %v1168_v32, %v1167_v30 }
 0x758   : > { %2153 = vmatprep.subr.bf16.mxu1 %v2152_v13 }
 0x759   : > { %2155 = vmatpush3.bf16.msra.mxu1 %v2152_v13 }
 0x75a   : > { %2156 = vmatprep.subr.bf16.mxu1 %v2326_v3 }
 0x825   : > { %v2051_v41 = vpop.f32.mrb[12].mxu0 }
 0x826   : > { %v1258_v42 = vpop.f32.mrb[13].mxu0  ;;  %v1281_v43 = vsel %vm1277_vm4, %v2051_v41, -inf }
 0x827   : > { %1282 = vmax.xlane.f32.xlu0 %v1281_v43  ;;  %v1278_v44 = vsel %vm1277_vm4, %v1258_v42, -inf }
 0x828   : > { %1279 = vmax.xlane.f32.xlu1 %v1278_v44 }
 0x829   : > { %v2054_v45 = vpop.f32.mrb[14].mxu0 }
 0x82a   : > { %v1268_v46 = vpop.f32.mrb[15].mxu0  ;;  %v1287_v47 = vsel %vm1277_vm4, %v2054_v45, -inf }
 0x82b   : > { %1288 = vmax.xlane.f32.xlu0 %v1287_v47  ;;  %v1284_v48 = vsel %vm1277_vm4, %v1268_v46, -inf }
 0x82c   : > { %1285 = vmax.xlane.f32.xlu1 %v1284_v48 }
 0x8b4   : > { %v1283_v49 = vpop.xlane.xlu0 %1282 }
 0x8b5   : > { %v1291_v50 = vsub.f32 %v2051_v41, %v1283_v49  ;;  %v1280_v51 = vpop.xlane.xlu1 %1279 }
 0x8b6   : > { %v1290_v11 = vsub.f32 %v1258_v42, %v1280_v51 }
 0x8b7   : > { %v1296_v52 = vmul.f32 1.442695, %v1291_v50 }
 0x8b8   : > { %v1294_v53 = vmul.f32 1.442695, %v1290_v11  ;;  %v1289_v54 = vpop.xlane.xlu0 %1288 }
 0x8b9   : > { %2242 = vpow2.f32 %v1296_v52  ;;  %v1293_v55 = vsub.f32 %v2054_v45, %v1289_v54  ;;  %v1286_v56 = vpop.xlane.xlu1 %1285 }
 0x8ba   : > { %2244 = vpow2.f32 %v1294_v53  ;;  %v1292_v57 = vsub.f32 %v1268_v46, %v1286_v56  ;;  %v1530_v53 = vld [vmem:[%s2784_s5 + $0x28] sm:$0xff] }
 0x8bb   : > { %v1300_v58 = vmul.f32 1.442695, %v1293_v55  ;;  %v1532_v55 = vld [vmem:[%s2784_s5 + $0x38] sm:$0xff] }
 0x8bc   : > { %v1298_v59 = vmul.f32 1.442695, %v1292_v57  ;;  %v1612_v57 = vld [vmem:[%s2783_s4 + $0xc0] sm:$0xff] }
 0x8bd   : > { %2246 = vpow2.f32 %v1300_v58  ;;  %v1613_v58 = vld [vmem:[%s2783_s4 + $0xc8] sm:$0xff] }
 0x8be   : > { %2248 = vpow2.f32 %v1298_v59  ;;  %v1614_v59 = vld [vmem:[%s2783_s4 + $0xd0] sm:$0xff] }
 0x8c3   : > { %v2243_v60 = vpop.eup %2242 }
 0x8c4   : > { %v2245_v61 = vpop.eup %2244  ;;  %v1305_v62 = vsel %vm1277_vm4, %v2243_v60, 0.0 }
 0x8c5   : > { %1306 = vadd.xlane.f32.xlu0 %v1305_v62  ;;  %v1302_v63 = vsel %vm1277_vm4, %v2245_v61, 0.0 }
 0x8c6   : > { %1303 = vadd.xlane.f32.xlu1 %v1302_v63  ;;  %v1616_v63 = vld [vmem:[%s2783_s4 + $0xe0] sm:$0xff] }
 0x8c7   : > { %v2247_v0 = vpop.eup %2246 }
 0x8c8   : > { %v2249_v1 = vpop.eup %2248  ;;  %v1311_v2 = vsel %vm1277_vm4, %v2247_v0, 0.0 }
 0x8c9   : > { %1312 = vadd.xlane.f32.xlu0 %v1311_v2  ;;  %v1308_v4 = vsel %vm1277_vm4, %v2249_v1, 0.0 }
 0x8ca   : > { %1309 = vadd.xlane.f32.xlu1 %v1308_v4 }
 0x952   : > { %v1307_v14 = vpop.xlane.xlu0 %1306 }
 0x953   : > { %2250 = vrcp.f32 %v1307_v14  ;;  %v1304_v16 = vpop.xlane.xlu1 %1303 }
 0x954   : > { %2252 = vrcp.f32 %v1304_v16  ;;  %v1619_v16 = vld [vmem:[%s2783_s4 + $0xf8] sm:$0xff] }
 0x956   : > { %v1313_v17 = vpop.xlane.xlu0 %1312 }
 0x957   : > { %2254 = vrcp.f32 %v1313_v17  ;;  %v1310_v18 = vpop.xlane.xlu1 %1309 }
 0x958   : > { %2256 = vrcp.f32 %v1310_v18  ;;  %v1880_v18 = vld [vmem:[%s2785_s6 + $0xd] ss:$0 sm:$0xff] }
 0x95d   : > { %v2251_v19 = vpop.eup %2250 }
 0x95e   : > { %v2253_v20 = vpop.eup %2252  ;;  %v1319_v22 = vmul.f32 %v2251_v19, %v2243_v60  ;;  %v2169_v60 = vpack.c.bf16 %v1613_v58, %v1612_v57 }
 0x95f   : > { %v1318_v21 = vmul.f32 %v2253_v20, %v2245_v61  ;;  %v1615_v61 = vld [vmem:[%s2783_s4 + $0xd8] sm:$0xff] }
 0x960   : > { %v2172_v62 = vpack.c.bf16 %v1615_v61, %v1614_v59 }
 0x961   : > { %v2255_v12 = vpop.eup %2254  ;;  %2059 = vmatprep.mubr.msk.f32.mxu1 %vm1277_vm4, %v1318_v21 }
 0x962   : > { %v2257_v23 = vpop.eup %2256  ;;  %2060 = vmatmul.mubr.msk.f32.vlgmr.msra.gmra.mrb[8].mxu1 %vm1277_vm4, %v1319_v22  ;;  %v1321_v26 = vmul.f32 %v2255_v12, %v2247_v0  ;;  %v1617_v0 = vld [vmem:[%s2783_s4 + $0xe8] sm:$0xff] }
 0x963   : > { %v1320_v25 = vmul.f32 %v2257_v23, %v2249_v1  ;;  %2158 = vmatpush3.bf16.msra.mxu1 %v2157_v29  ;;  %v2175_v1 = vpack.c.bf16 %v1617_v0, %v1616_v63  ;;  %v1882_v12 = vld [vmem:[%s2785_s6 + $0x8] ss:$0 sm:$0xff] }
 0x964   : > { %2159 = vmatprep.subr.bf16.mxu1 %v2326_v3 }
 0x965   : > { %2062 = vmatprep.mubr.msk.f32.mxu1 %vm1277_vm4, %v1320_v25 }
 0x966   : > { %2063 = vmatmul.mubr.msk.f32.gmra.mrb[10].mxu1 %vm1277_vm4, %v1321_v26 }
 0x967   : > { %2073 = vmatprep.mubr.msk.f32.mxu1 %vm2327_vm0, %v2328_v6  ;;  %2161 = vmatpush3.bf16.msra.mxu1 %v2160_v34 }
 0x968   : > { %2168 = vmatprep.subr.bf16.mxu1 %v2326_v3 }
 0xa35   : > { %v2061_v35 = vpop.f32.mrb[8].mxu1 }
 0xa36   : > { %v1420_v37 = vmul.f32 %v2061_v35, %v2492_v31  ;;  %v1400_v38 = vpop.f32.mrb[9].mxu1  ;;  %v1876_v31 = vld [vmem:[%s2785_s6 + $0x7] ss:$0 sm:$0xff] }
 0xa37   : > { %v1419_v39 = vmul.f32 %v2481_v24, %v1400_v38 }
 0xa39   : > { %v1421_v40 = vadd.f32 %v1420_v37, %v1419_v39  ;;  %v2064_v41 = vpop.f32.mrb[10].mxu1 }
 0xa3a   : > { %v1410_v42 = vpop.f32.mrb[11].mxu1  ;;  %v1424_v44 = vmul.f32 %v2064_v41, %v2507_v36 }
 0xa3b   : > { %v1422_v43 = vmul.f32 %v2498_v33, %v1410_v42 }
 0xa3d   : > { %v1423_v45 = vadd.f32 %v1422_v43, %v1421_v40 }
 0xa3f   : > { %v1425_v46 = vadd.f32 %v1424_v44, %v1423_v45 }
 0xa41   : > { %2074 = vmatmul.mubr.msk.f32.vlgmr.msra.gmra.mrb[12].mxu1 %vm342_vm1, %v1425_v46 }
 0xa42   : > { %2103 = vmatprep.mubr.msk.f32.mxu1 %vm2327_vm0, %v2328_v6  ;;  %v1529_v6 = vld [vmem:[%s2784_s5 + $0x20] sm:$0xff]  ;;  %2170 = vmatpush3.bf16.msra.mxu1 %v2169_v60 }
 0xa43   : > { %v2163_v54 = vpack.c.bf16 %v1530_v53, %v1529_v6  ;;  %2171 = vmatprep.subr.bf16.mxu1 %v2326_v3 }
 0xa45   : > { %2164 = vmatpush3.bf16.msra.mxu0 %v2163_v54 }
 0xa46   : > { %2165 = vmatprep.subr.bf16.mxu0 %v2326_v3  ;;  %2173 = vmatpush3.bf16.msra.mxu1 %v2172_v62 }
 0xa47   : > { %2174 = vmatprep.subr.bf16.mxu1 %v2326_v3 }
 0xa4a   : > { %2176 = vmatpush3.bf16.msra.mxu1 %v2175_v1 }
 0xa4b   : > { %2177 = vmatprep.subr.bf16.mxu1 %v2326_v3  ;;  %v1618_v3 = vld [vmem:[%s2783_s4 + $0xf0] sm:$0xff] }
 0xa4c   : > { %v2178_v17 = vpack.c.bf16 %v1619_v16, %v1618_v3 }
 0xa4e   : > { %2179 = vmatpush3.bf16.msra.mxu1 %v2178_v17 }
 0xb14   : > { %v1499_v47 = vpop.f32.mrb[12].mxu1 }
 0xb15   : > { %v1500_v24 = vadd.f32 %v1876_v31, %v1499_v47  ;;  %v2075_v48 = vpop.f32.mrb[13].mxu1 }
 0xb17   : > { %v1503_v49 = vadd.f32 %v1500_v24, %v2593_v15  ;;  %v1531_v15 = vld [vmem:[%s2784_s5 + $0x30] sm:$0xff] }
 0xb18   : > { %v2166_v56 = vpack.c.bf16 %v1532_v55, %v1531_v15 }
 0xb19   : > { %v1506_v33 = vsel %vm342_vm1, %v1503_v49, 0.0 }
 0xb1a   : > { %1507 = vadd.xlane.f32.xlu1 %v1506_v33  ;;  %2167 = vmatpush3.bf16.msra.mxu0 %v2166_v56 }
 0xba7   : > { %v1508_v36 = vpop.xlane.xlu1 %1507 }
 0xba8   : > { %v1509_v50 = vmul.f32 0.03125, %v1508_v36 }
 0xbaa   : > { %v1510_v51 = vsub.f32 %v1503_v49, %v1509_v50 }
 0xbac   : > { %v1511_v11 = vmul.f32 %v1510_v51, %v1510_v51 }
 0xbae   : > { %v1512_v52 = vsel %vm342_vm1, %v1511_v11, 0.0 }
 0xbaf   : > { %1513 = vadd.xlane.f32.xlu0 %v1512_v52 }
 0xc3c   : > { %v1514_v2 = vpop.xlane.xlu0 %1513 }
 0xc3d   : > { %v1515_v4 = vmul.f32 0.03125, %v1514_v2 }
 0xc3f   : > { %v1516_v5 = vadd.f32 1e-05, %v1515_v4 }
 0xc41   : > { %2258 = vrsqrt.f32 %v1516_v5 }
 0xc4b   : > { %v2259_v7 = vpop.eup %2258 }
 0xc4c   : > { %v1518_v9 = vmul.f32 %v2259_v7, %v1510_v51 }
 0xc4e   : > { %v1523_v13 = vmul.f32 %v1878_v8, %v1518_v9 }
 0xc50   : > { %v1528_v14 = vadd.f32 %v1879_v10, %v1523_v13 }
 0xc52   : > { %2085 = vmatmul.mubr.msk.f32.vlgmr.msra.gmra.mrb[16].mxu0 %vm342_vm1, %v1528_v14 }
 0xd25   : > { %v1607_v19 = vpop.f32.mrb[16].mxu0 }
 0xd26   : > { %v1608_v20 = vadd.f32 %v1880_v18, %v1607_v19  ;;  %v2086_v21 = vpop.f32.mrb[17].mxu0 }
 0xd28   : > { %v1611_v22 = vmax.f32 %v1608_v20, 0.0 }
 0xd2a   : > { %2104 = vmatmul.mubr.msk.f32.vlgmr.msra.gmra.mrb[14].mxu1 %vm1625_vm5, %v1611_v22 }
 0xdfd   : > { %v1695_v23 = vpop.f32.mrb[14].mxu1 }
 0xdfe   : > { %v1696_v25 = vadd.f32 %v1882_v12, %v1695_v23  ;;  %v2105_v26 = vpop.f32.mrb[15].mxu1 }
 0xe00   : > { %v1699_v27 = vadd.f32 %v1696_v25, %v1528_v14 }
 0xe02   : > { %v1700_v28 = vsel %vm342_vm1, %v1699_v27, 0.0 }
 0xe03   : > { %1701 = vadd.xlane.f32.xlu1 %v1700_v28 }
 0xe90   : > { %v1702_v29 = vpop.xlane.xlu1 %1701 }
 0xe91   : > { %v1703_v30 = vmul.f32 0.03125, %v1702_v29 }
 0xe93   : > { %v1704_v32 = vsub.f32 %v1699_v27, %v1703_v30 }
 0xe95   : > { %v1705_v34 = vmul.f32 %v1704_v32, %v1704_v32 }
 0xe97   : > { %v1706_v35 = vsel %vm342_vm1, %v1705_v34, 0.0 }
 0xe98   : > { %1707 = vadd.xlane.f32.xlu0 %v1706_v35 }
 0xf25   : > { %v1708_v37 = vpop.xlane.xlu0 %1707 }
 0xf26   : > { %v1709_v38 = vmul.f32 0.03125, %v1708_v37 }
 0xf28   : > { %v1710_v39 = vadd.f32 1e-05, %v1709_v38 }
 0xf2a   : > { %2260 = vrsqrt.f32 %v1710_v39 }
 0xf34   : > { %v2261_v40 = vpop.eup %2260 }
 0xf35   : > { %v1712_v41 = vmul.f32 %v2261_v40, %v1704_v32 }
 0xf37   : > { %v1713_v42 = vmul.f32 %v1878_v8, %v1712_v41 }
 0xf39   : > { %v1714_v43 = vadd.f32 %v1879_v10, %v1713_v42 }
 0xf3b   : > { %1715 = vst.msk [vmem:[%s312_s13] sm:$0xff] %vm342_vm1, %v1714_v43 }
 0xf3c   : > { %2275 = shalt.err (!%p2272_p3)
}
 0xf3d   : > { %s2276_s21 = scalar_lea.hbm %s2736_s16, 128  ;;  %s2280_s8 = scalar_lea.hbm %s2786_s7, 256 }
 0xf3e   : > { %p2277_p4 = scmp.ne.s32.totalorder %s2736_s16, %s2276_s21  ;;  %p2281_p9 = scmp.lt.u32.totalorder %s2736_s16, %s2786_s7 }
 0xf3f   : > { %p2282_p10 = scmp.lt.u32.totalorder %s2280_s8, %s2276_s21  ;;  %p2284_p12 = scmp.lt.u32.totalorder %s2276_s21, %s2736_s16 }
 0xf40   : > { %p2278_p7 = pnand %p2277_p4, %p2410_p5 }
 0xf41   : > { %p2283_p11 = por %p2282_p10, %p2281_p9 }
 0xf42   : > { %p2279_p8 = pneg %p2278_p7 }
 0xf43   : > { %p2285_p13 = por %p2284_p12, %p2283_p11 }
 0xf45   : > { %p2286_p0 = pnand %p2285_p13, %p2279_p8 }
 0xf47   : > { %2289 = shalt.err (!%p2286_p0)
}
 0xf48   : > { %2180 = dma.vmem_to_hbm [thread:$0]  (%p2410_p5), %s2738_s29, 128, %s2736_s16, %s1717_s17  }
 0xf49 PF: > { %p2186_p1 = scmp.ge.s32.totalorder %s2324_s27, 2  ;;  %s1742_s14 = sand.u32 1, %s2312_s24  }
 0xf4a   : > { %s1743_s15 = scalar_lea.sflag [#allocation3], %s1742_s14 }
 0xf4b   : > { %p2183_p2 = pnand %p2186_p1, %p2414_p6 }
 0xf4d   : > { %2307 = dma.done.wait (!%p2183_p2), %s1743_s15, 128  }
 0xf4e   : > { %2309 = vsyncadd (!%p2183_p2), %s1743_s15, 4294967168  ;;  %p17_p3 = scmp.ge.s32.totalorder %s2397_s30, 4   ;;  %s2789_s24 = smov %s2316_s25 }
 0xf4f   : > { %s2790_s25 = smov %s2320_s26  ;;  %s2791_s26 = smov %s2408_s10 }
 0xf50   : > { %s2792_s27 = smov %s2397_s30  ;;  %19 = sbr.rel (!%p17_p3) target bundleno = 3 (0x3), region = 92 }
 0xf57   :  { %1748 = vsyncpa [#allocation3], 1 }
 0xf58   :  { %1750 = vsyncpa [#allocation3 + $0x1], 1 }

</bundles_post_ra>
